<compile_context>
chip_gen: v5e
topology: v5e:2x2
jax: 0.10.0
libtpu: 0.0.40
codegen_flags: <defaults>
</compile_context>

<pallas_src>
import functools

import jax
import jax.numpy as jnp
from jax.experimental import pallas as pl
from jax.experimental.pallas import tpu as pltpu


def weighted_agg_kernel(aux_ref, w_ref, out_ref, attn_ref, *,
                        use_bf16_matmul, total_batch, ragged):
    # aux_ref: (bt, V, D) batch tile; w_ref: (D, D) resident weight
    # out_ref: (bt, D) output slab; attn_ref: (bt, Vp) lane-dense attn weights
    bt, V, D = aux_ref.shape
    Vp = attn_ref.shape[-1]
    R = bt * V

    aux = aux_ref[...].astype(jnp.float32)                        # (bt, V, D)
    w = w_ref[...].astype(jnp.float32)                            # (D, D)
    aux2 = aux.reshape(R, D)                                      # leading-dim merge

    # Row / column -> batch-block index helpers (f32 mul+floor; no vector
    # integer division on the VPU).  Exact: boundaries are >= 0.5/V away.
    def block_of(ids_i32):
        return jnp.floor(
            (ids_i32.astype(jnp.float32) + 0.5) * (1.0 / V)).astype(jnp.int32)

    row_ids = jax.lax.broadcasted_iota(jnp.int32, (R, 1), 0)      # i
    col_ids = jax.lax.broadcasted_iota(jnp.int32, (1, R), 1)      # j
    row_blk = block_of(row_ids)                                   # (R, 1): i // V
    col_blk = block_of(col_ids)                                   # (1, R): j // V

    if ragged:
        # Zero the padded batch rows of the ragged last block so unspecified
        # boundary reads can never pollute valid rows through the matmuls.
        valid = (pl.program_id(0) * bt + row_blk) < total_batch   # (R, 1)
        aux2 = jnp.where(valid, aux2, 0.0)

    if use_bf16_matmul:
        # bf16 MXU operands / f32 accumulation (numerics differ slightly from
        # the exact-f32 PyTorch module; gated off by default).
        lhs, rhs = aux2.astype(jnp.bfloat16), w.astype(jnp.bfloat16)
    else:
        lhs, rhs = aux2, w

    # (1) Projection: ONE (bt*V, D) @ (D, D) MXU matmul per grid step.
    m = jnp.dot(lhs, rhs, preferred_element_type=jnp.float32)     # (R, D) f32

    # (2) Fused Gram: ONE (R, D) x (R, D) contraction on the feature dim
    #     (full MXU rows) instead of bt tiny batched (V, D) @ (D, V) matmuls.
    gm = m.astype(jnp.bfloat16) if use_bf16_matmul else m
    gram = jax.lax.dot_general(gm, gm, (((1,), (1,)), ((), ())),
                               preferred_element_type=jnp.float32)  # (R, R)

    # (3) ReLU + block-diagonal mask (keep only same-batch view pairs).  A
    #     select (not a multiply) so masked garbage cannot produce NaN.
    relu = jnp.where(row_blk == col_blk, jnp.maximum(gram, 0.0), 0.0)

    # (4) Column sums; cross-batch entries are zero, so the sum over ALL rows
    #     equals the per-batch row sum of the PyTorch (V, V) block.
    colsum = jnp.sum(relu, axis=0, keepdims=True)                 # (1, R)

    # (5) Regroup per batch row in a block-diagonal (bt, R) layout:
    #     cs_wide[b, j] = colsum[j] iff column j belongs to batch row b.
    b_ids = jax.lax.broadcasted_iota(jnp.int32, (bt, 1), 0)       # (bt, 1)
    cs_wide = jnp.where(b_ids == col_blk, colsum, 0.0)            # (bt, R)

    # (6) Normalise with an EXACT reciprocal (only bt scalars; approx recip
    #     would only cost accuracy).  All-zero ReLU blocks give 0/0 -> NaN,
    #     matching the PyTorch module.
    total = jnp.sum(cs_wide, axis=1, keepdims=True)               # (bt, 1)
    attn_wide = cs_wide * pl.reciprocal(total)                    # (bt, R)

    # (7) Weighted view-sum as ONE (bt, R) @ (R, D) f32 MXU matmul.
    out = jnp.dot(attn_wide, aux2, preferred_element_type=jnp.float32)
    out_ref[...] = out.astype(out_ref.dtype)

    # (8) Lane-dense attention output: fold the block-diagonal weights to
    #     (bt, Vp) with a tiny selector matmul.  Lanes >= V are zero, so the
    #     store is a full-width unmasked vst; the wrapper slices [:, :V].
    row_view = row_ids - V * row_blk                              # (R, 1): i % V
    w_ids = jax.lax.broadcasted_iota(jnp.int32, (1, Vp), 1)       # (1, Vp)
    p_sel = (row_view == w_ids).astype(jnp.float32)               # (R, Vp)
    attn_ref[...] = jnp.dot(
        attn_wide, p_sel, preferred_element_type=jnp.float32
    ).astype(attn_ref.dtype)


def _pick_batch_tile(B, V, batch_tile=32):
    """Batch rows per grid step.  Full batch when small; otherwise an 8-aligned
    tile targeting bt*V ~= 256 MXU rows per step (projection and fused Gram
    both feed full MXU blocks) without exceeding `batch_tile`.  No forced
    multi-step split (single-TensorCore v5e/v6e gain nothing from it)."""
    if B <= 8:
        return B
    bt = max(8, (256 // max(V, 1)) // 8 * 8)
    bt = max(8, min(batch_tile, bt))
    bt = min(bt, B)
    if bt < B:
        bt = max(8, bt // 8 * 8)        # 8-row aligned output blocks when tiled
    return bt


def weighted_aggregate(aux, attention_weights, *, batch_tile=32,
                       use_bf16_matmul=False):
    """aux: (B, V, D) backbone features; attention_weights: (D, D).

    Returns (output (B, D), final_attention_weights (B, V)), matching the
    PyTorch forward (for B > 1 the trailing .squeeze() is a no-op)."""
    B, V, D = aux.shape
    bt = _pick_batch_tile(B, V, batch_tile)
    grid = pl.cdiv(B, bt)
    Vp = 128 * pl.cdiv(V, 128)          # lane-dense attention-weights width

    kernel = functools.partial(
        weighted_agg_kernel,
        use_bf16_matmul=use_bf16_matmul,
        total_batch=B,
        ragged=(B % bt != 0),
    )

    # Rough per-step VMEM need (double-buffered blocks + main temporaries),
    # used only to size the scoped-VMEM limit with headroom (well under v7x's
    # 64 MiB physical VMEM).
    R = bt * V
    step_bytes = 4 * (2 * bt * V * D + 2 * D * D + 2 * bt * D + 2 * bt * Vp
                      + R * D + R * R + 3 * bt * R)
    vmem_limit = int(min(48 * 2 ** 20, max(32 * 2 ** 20, 2 * step_bytes)))

    out, attn_p = pl.pallas_call(
        kernel,
        out_shape=(
            jax.ShapeDtypeStruct((B, D), aux.dtype),
            jax.ShapeDtypeStruct((B, Vp), jnp.float32),
        ),
        grid_spec=pltpu.PrefetchScalarGridSpec(
            num_scalar_prefetch=0,
            grid=(grid,),
            in_specs=[
                pl.BlockSpec((bt, V, D), lambda g: (g, 0, 0)),
                # Resident (D, D) weight, same block every step.
                pl.BlockSpec((D, D), lambda g: (0, 0)),
            ],
            out_specs=[
                pl.BlockSpec((bt, D), lambda g: (g, 0)),
                pl.BlockSpec((bt, Vp), lambda g: (g, 0)),
            ],
        ),
        compiler_params=pltpu.CompilerParams(
            dimension_semantics=("parallel",),
            vmem_limit_bytes=vmem_limit,
        ),
    )(aux, attention_weights)

    return out, attn_p[:, :V]


def _reference(aux, w):
    # Pure-JAX reference mirroring the PyTorch forward exactly (f32, HIGHEST
    # matmul precision so the comparison is against true-f32 math).
    hi = jax.lax.Precision.HIGHEST
    m = jnp.einsum("bvd,de->bve", aux, w, precision=hi)
    p = jnp.einsum("bvd,bwd->bvw", m, m, precision=hi)
    r = jnp.maximum(p, 0.0)
    s = jnp.sum(r, axis=(1, 2))                           # (B,)
    attn = jnp.sum(r, axis=1) / s[:, None]                # (B, V)
    out = jnp.sum(aux * attn[:, :, None], axis=1)         # (B, D)
    return out, attn


if __name__ == "__main__":
    # batch=32, views=8, feat_dim=128 (lane-aligned); bt=32 -> one grid step
    # with 256 MXU rows per matmul, no padding.
    B, V, D = 32, 8, 128

    key = jax.random.PRNGKey(0)
    k_feat, k_w = jax.random.split(key)

    # Backbone features (stand-in for model(mvimages) -> (B, V, feat_dim)).
    features = jax.random.normal(k_feat, (B, V, D), dtype=jnp.float32)

    # attention_weights ~ Uniform(-1, 1): (r1 - r2) * rand + r2 with r1=-1, r2=1.
    attention_weights = jax.random.uniform(
        k_w, (D, D), dtype=jnp.float32, minval=-1.0, maxval=1.0)

    out, attn = weighted_aggregate(features, attention_weights)
    jax.block_until_ready((out, attn))

    ref_out, ref_attn = _reference(features, attention_weights)
    assert out.shape == (B, D) and attn.shape == (B, V)
    # Exact reciprocal + f32 MXU accumulation -> only matmul-pass-level error.
    assert jnp.allclose(out, ref_out, rtol=5e-4, atol=5e-4), (
        float(jnp.max(jnp.abs(out - ref_out))))
    assert jnp.allclose(attn, ref_attn, rtol=5e-4, atol=5e-4), (
        float(jnp.max(jnp.abs(attn - ref_attn))))

    print("KERNEL_OK")
</pallas_src>

<mosaic_0001>
module attributes {stable_mosaic.version = 11 : i64} {
  func.func @weighted_agg_kernel(%arg0: i32, %arg1: memref<32x8x128xf32, #tpu.memory_space<vmem>>, %arg2: memref<128x128xf32, #tpu.memory_space<vmem>>, %arg3: memref<32x128xf32, #tpu.memory_space<vmem>>, %arg4: memref<32x128xf32, #tpu.memory_space<vmem>>) attributes {dimension_semantics = [#tpu.dimension_semantics<parallel>], iteration_bounds = array<i64: 1>, scalar_prefetch = 0 : i64, scratch_operands = 0 : i64, tpu.core_type = #tpu.core_type<tc>, window_params = [{transform_indices = @transform_0, window_bounds = array<i64: 32, 8, 128>}, {pipeline_mode = #tpu.pipeline_mode<synchronous>, transform_indices = @transform_1, window_bounds = array<i64: 128, 128>}, {transform_indices = @transform_2, window_bounds = array<i64: 32, 128>}, {transform_indices = @transform_3, window_bounds = array<i64: 32, 128>}]} {
    %c0 = arith.constant 0 : index
    %c0_0 = arith.constant 0 : index
    %c0_1 = arith.constant 0 : index
    %0 = vector.load %arg1[%c0, %c0_0, %c0_1] : memref<32x8x128xf32, #tpu.memory_space<vmem>>, vector<32x8x128xf32>
    %c0_2 = arith.constant 0 : index
    %c0_3 = arith.constant 0 : index
    %1 = vector.load %arg2[%c0_2, %c0_3] : memref<128x128xf32, #tpu.memory_space<vmem>>, vector<128x128xf32>
    %2 = vector.shape_cast %0 : vector<32x8x128xf32> to vector<256x128xf32>
    %3 = tpu.iota {dimensions = array<i32: 0>} : vector<256x1xi32>
    %4 = tpu.iota {dimensions = array<i32: 1>} : vector<1x256xi32>
    %5 = arith.sitofp %3 : vector<256x1xi32> to vector<256x1xf32>
    %cst = arith.constant 5.000000e-01 : f32
    %6 = vector.broadcast %cst : f32 to vector<256x1xf32>
    %7 = arith.addf %5, %6 : vector<256x1xf32>
    %cst_4 = arith.constant 1.250000e-01 : f32
    %8 = vector.broadcast %cst_4 : f32 to vector<256x1xf32>
    %9 = arith.mulf %7, %8 : vector<256x1xf32>
    %10 = math.floor %9 : vector<256x1xf32>
    %11 = arith.fptosi %10 : vector<256x1xf32> to vector<256x1xi32>
    %12 = arith.sitofp %4 : vector<1x256xi32> to vector<1x256xf32>
    %cst_5 = arith.constant 5.000000e-01 : f32
    %13 = vector.broadcast %cst_5 : f32 to vector<1x256xf32>
    %14 = arith.addf %12, %13 : vector<1x256xf32>
    %cst_6 = arith.constant 1.250000e-01 : f32
    %15 = vector.broadcast %cst_6 : f32 to vector<1x256xf32>
    %16 = arith.mulf %14, %15 : vector<1x256xf32>
    %17 = math.floor %16 : vector<1x256xf32>
    %18 = arith.fptosi %17 : vector<1x256xf32> to vector<1x256xi32>
    %cst_7 = arith.constant dense<0.000000e+00> : vector<256x128xf32>
    %19 = tpu.matmul %2, %1, %cst_7 {dimension_numbers = #tpu.dot_dimension_numbers<[1], [0], [0], [1], [0, 0, 1, 1], [], []>} : vector<256x128xf32>, vector<128x128xf32>, vector<256x128xf32> -> vector<256x128xf32>
    %cst_8 = arith.constant dense<0.000000e+00> : vector<256x256xf32>
    %20 = tpu.matmul %19, %19, %cst_8 {dimension_numbers = #tpu.dot_dimension_numbers<[1], [1], [0], [0], [0, 0, 1, 0], [], []>} : vector<256x128xf32>, vector<256x128xf32>, vector<256x256xf32> -> vector<256x256xf32>
    %21 = vector.broadcast %11 : vector<256x1xi32> to vector<256x256xi32>
    %22 = vector.broadcast %18 : vector<1x256xi32> to vector<256x256xi32>
    %23 = arith.cmpi eq, %21, %22 : vector<256x256xi32>
    %cst_9 = arith.constant 0.000000e+00 : f32
    %24 = vector.broadcast %cst_9 : f32 to vector<256x256xf32>
    %25 = arith.maximumf %20, %24 : vector<256x256xf32>
    %cst_10 = arith.constant 0.000000e+00 : f32
    %26 = vector.broadcast %cst_10 : f32 to vector<256x256xf32>
    %27 = arith.select %23, %25, %26 : vector<256x256xi1>, vector<256x256xf32>
    %cst_11 = arith.constant dense<0.000000e+00> : vector<256xf32>
    %28 = vector.multi_reduction <add>, %27, %cst_11 [0] : vector<256x256xf32> to vector<256xf32>
    %29 = vector.shape_cast %28 : vector<256xf32> to vector<1x256xf32>
    %30 = tpu.iota {dimensions = array<i32: 0>} : vector<32x1xi32>
    %31 = vector.broadcast %30 : vector<32x1xi32> to vector<32x256xi32>
    %32 = vector.broadcast %18 : vector<1x256xi32> to vector<32x256xi32>
    %33 = arith.cmpi eq, %31, %32 : vector<32x256xi32>
    %cst_12 = arith.constant 0.000000e+00 : f32
    %34 = vector.shape_cast %29 : vector<1x256xf32> to vector<1x256xf32>
    %35 = vector.broadcast %34 : vector<1x256xf32> to vector<32x256xf32>
    %36 = vector.broadcast %cst_12 : f32 to vector<32x256xf32>
    %37 = arith.select %33, %35, %36 : vector<32x256xi1>, vector<32x256xf32>
    %cst_13 = arith.constant dense<0.000000e+00> : vector<32xf32>
    %38 = vector.multi_reduction <add>, %37, %cst_13 [1] : vector<32x256xf32> to vector<32xf32>
    %39 = vector.shape_cast %38 : vector<32xf32> to vector<32x1xf32>
    %40 = tpu.reciprocal %39 : vector<32x1xf32> -> vector<32x1xf32>
    %41 = vector.broadcast %40 : vector<32x1xf32> to vector<32x256xf32>
    %42 = arith.mulf %37, %41 : vector<32x256xf32>
    %cst_14 = arith.constant dense<0.000000e+00> : vector<32x128xf32>
    %43 = tpu.matmul %42, %2, %cst_14 {dimension_numbers = #tpu.dot_dimension_numbers<[1], [0], [0], [1], [0, 0, 1, 1], [], []>} : vector<32x256xf32>, vector<256x128xf32>, vector<32x128xf32> -> vector<32x128xf32>
    %c0_15 = arith.constant 0 : index
    %c0_16 = arith.constant 0 : index
    %44 = vector.load %arg3[%c0_15, %c0_16] : memref<32x128xf32, #tpu.memory_space<vmem>>, vector<32x128xf32>
    tpu.vector_store %arg3[%c0_15, %c0_16], %43 {strides = array<i32>} : memref<32x128xf32, #tpu.memory_space<vmem>>, vector<32x128xf32>,
    %c8_i32 = arith.constant 8 : i32
    %45 = vector.broadcast %c8_i32 : i32 to vector<256x1xi32>
    %46 = arith.muli %45, %11 : vector<256x1xi32>
    %47 = arith.subi %3, %46 : vector<256x1xi32>
    %48 = tpu.iota {dimensions = array<i32: 1>} : vector<1x128xi32>
    %49 = vector.broadcast %47 : vector<256x1xi32> to vector<256x128xi32>
    %50 = vector.broadcast %48 : vector<1x128xi32> to vector<256x128xi32>
    %51 = arith.cmpi eq, %49, %50 : vector<256x128xi32>
    %52 = arith.extui %51 : vector<256x128xi1> to vector<256x128xi32>
    %53 = arith.sitofp %52 : vector<256x128xi32> to vector<256x128xf32>
    %cst_17 = arith.constant dense<0.000000e+00> : vector<32x128xf32>
    %54 = tpu.matmul %42, %53, %cst_17 {dimension_numbers = #tpu.dot_dimension_numbers<[1], [0], [0], [1], [0, 0, 1, 1], [], []>} : vector<32x256xf32>, vector<256x128xf32>, vector<32x128xf32> -> vector<32x128xf32>
    %c0_18 = arith.constant 0 : index
    %c0_19 = arith.constant 0 : index
    %55 = vector.load %arg4[%c0_18, %c0_19] : memref<32x128xf32, #tpu.memory_space<vmem>>, vector<32x128xf32>
    tpu.vector_store %arg4[%c0_18, %c0_19], %54 {strides = array<i32>} : memref<32x128xf32, #tpu.memory_space<vmem>>, vector<32x128xf32>,
    return
  }
  func.func @transform_0(%arg0: i32) -> (i32, i32, i32) {
    %c0_i32 = arith.constant 0 : i32
    %c0_i32_0 = arith.constant 0 : i32
    %c0_i32_1 = arith.constant 0 : i32
    return %arg0, %c0_i32, %c0_i32_0 : i32, i32, i32
  }
  func.func @transform_1(%arg0: i32) -> (i32, i32) {
    %c0_i32 = arith.constant 0 : i32
    %c0_i32_0 = arith.constant 0 : i32
    %c0_i32_1 = arith.constant 0 : i32
    return %c0_i32, %c0_i32_0 : i32, i32
  }
  func.func @transform_2(%arg0: i32) -> (i32, i32) {
    %c0_i32 = arith.constant 0 : i32
    %c0_i32_0 = arith.constant 0 : i32
    return %arg0, %c0_i32 : i32, i32
  }
  func.func @transform_3(%arg0: i32) -> (i32, i32) {
    %c0_i32 = arith.constant 0 : i32
    %c0_i32_0 = arith.constant 0 : i32
    return %arg0, %c0_i32 : i32, i32
  }
}

</mosaic_0001>

<bundles_post_ra>
// kernel: tpu_custom_call.1
= control target key start
LH: loop header
LB: loop body
LE: loop exit
PB: predicated region body
PF: predicated region fallthrough
CT: control target
= control target key end

     0   :  { %9 = vsyncpa [#allocation3], 0  ;;  %s2639_s0 = inlined_call_operand.hbm [shape: f32[32,8,128], index: 0, kind: input, shape index: {}]   ;;  %s2640_s1 = inlined_call_operand.hbm [shape: f32[128,128], index: 1, kind: input, shape index: {}]   ;;  %s2641_s2 = inlined_call_operand.hbm [shape: f32[32,128], index: 2, kind: output, shape index: {0}]   ;;  %s2642_s3 = inlined_call_operand.hbm [shape: f32[32,128], index: 3, kind: output, shape index: {1}]  }
   0x1   :  { %10 = vsyncpa [#allocation6], 0 }
   0x2   :  { %11 = vsyncpa [#allocation4], 0 }
   0x3   :  { %12 = vsyncpa [#allocation9], 0  ;;  %s17_s14 = sshll.u32 %s2639_s0, 4  ;;  %s1603_s15 = smov [#allocation2]   ;;  %s18_s14 = int_to_ptr.hbm [resolvable:$true] %s17_s14 }
   0x4   :  { %s19_s16 = sshll.u32 %s1603_s15, 4  ;;  %s30_s19 = sshll.u32 %s2640_s1, 4  ;;  %s20_s16 = int_to_ptr.vmem [resolvable:$true] %s19_s16  ;;  %s31_s19 = int_to_ptr.hbm [resolvable:$true] %s30_s19 }
   0x5   :  { %s1604_s20 = smov 128   ;;  %s1605_s21 = smov 8  }
   0x6   :  { %25 = dma.hbm_to_vmem [thread:$0]  %s18_s14, 4096, %s20_s16, [#allocation3], %s1604_s20, %s1604_s20, %s1605_s21  }
   0x7   :  { %s1606_s22 = smov [#allocation5]  }
   0x8   :  { %s32_s23 = sshll.u32 %s1606_s22, 4  ;;  %s33_s23 = int_to_ptr.vmem [resolvable:$true] %s32_s23 }
   0x9   :  { %38 = dma.hbm_to_vmem [thread:$0]  %s31_s19, 2048, %s33_s23, [#allocation6], %s1604_s20, %s1604_s20, %s1605_s21  }
   0xa   :  { %1595 = dma.done.wait [#allocation3], 4096  }
   0xb   :  { %1596 = vsyncadd [#allocation3], 4294963200 }
   0xc   :  { %1597 = dma.done.wait [#allocation6], 2048  }
   0xd   :  { %1598 = vsyncadd [#allocation6], 4294965248  ;;  %v94_v0 = vld [vmem:[#allocation5 + $0x78] sm:$0xff]  ;;  %v93_v1 = vld [vmem:[#allocation5 + $0x70] sm:$0xff]  ;;  %s1608_s0 = smov [#allocation7]   ;;  %s1288_s26 = sshll.u32 %s2641_s2, 4  ;;  %s1289_s26 = int_to_ptr.hbm [resolvable:$true] %s1288_s26 }
   0xe   :  { %301 = vmatpush.msra.mxu0 %v94_v0  ;;  %v92_v2 = vld [vmem:[#allocation5 + $0x68] sm:$0xff]  ;;  %v91_v3 = vld [vmem:[#allocation5 + $0x60] sm:$0xff]  ;;  %v90_v4 = vld [vmem:[#allocation5 + $0x58] sm:$0xff]  ;;  %s1286_s1 = sshll.u32 %s1608_s0, 4  ;;  %s1609_s2 = smov [#allocation8]   ;;  %s1287_s1 = int_to_ptr.vmem [resolvable:$true] %s1286_s1 }
   0xf   :  { %v89_v5 = vld [vmem:[#allocation5 + $0x50] sm:$0xff]  ;;  %v88_v6 = vld [vmem:[#allocation5 + $0x48] sm:$0xff]  ;;  %v87_v7 = vld [vmem:[#allocation5 + $0x40] sm:$0xff]  ;;  %s1299_s27 = sshll.u32 %s1609_s2, 4  ;;  %s1301_s30 = sshll.u32 %s2642_s3, 4  ;;  %s1300_s27 = int_to_ptr.vmem [resolvable:$true] %s1299_s27  ;;  %s1302_s30 = int_to_ptr.hbm [resolvable:$true] %s1301_s30 }
  0x10   :  { %302 = vmatpush.msra.mxu0 %v93_v1  ;;  %v86_v8 = vld [vmem:[#allocation5 + $0x38] sm:$0xff]  ;;  %v85_v9 = vld [vmem:[#allocation5 + $0x30] sm:$0xff]  ;;  %v84_v10 = vld [vmem:[#allocation5 + $0x28] sm:$0xff] }
  0x11   :  { %v83_v11 = vld [vmem:[#allocation5 + $0x20] sm:$0xff]  ;;  %v82_v12 = vld [vmem:[#allocation5 + $0x18] sm:$0xff]  ;;  %v81_v13 = vld [vmem:[#allocation5 + $0x10] sm:$0xff] }
  0x12   :  { %303 = vmatpush.msra.mxu0 %v92_v2  ;;  %v80_v14 = vld [vmem:[#allocation5 + $0x8] sm:$0xff]  ;;  %v79_v15 = vld [vmem:[#allocation5] sm:$0xff]  ;;  %v1648_v18 = vld [vmem:[#allocation2 + $0x10] sm:$0xff] }
  0x13   :  { %v1642_v16 = vld [vmem:[#allocation2] sm:$0xff]  ;;  %v1645_v17 = vld [vmem:[#allocation2 + $0x8] sm:$0xff]  ;;  %v1651_v19 = vld [vmem:[#allocation2 + $0x18] sm:$0xff] }
  0x14   :  { %304 = vmatpush.msra.mxu0 %v91_v3  ;;  %v1654_v20 = vld [vmem:[#allocation2 + $0x20] sm:$0xff]  ;;  %v1657_v21 = vld [vmem:[#allocation2 + $0x28] sm:$0xff]  ;;  %v1660_v22 = vld [vmem:[#allocation2 + $0x30] sm:$0xff] }
  0x15   :  { %v1663_v23 = vld [vmem:[#allocation2 + $0x38] sm:$0xff]  ;;  %v1666_v24 = vld [vmem:[#allocation2 + $0x40] sm:$0xff]  ;;  %v1669_v25 = vld [vmem:[#allocation2 + $0x48] sm:$0xff] }
  0x16   :  { %305 = vmatpush.msra.mxu0 %v90_v4  ;;  %v1672_v26 = vld [vmem:[#allocation2 + $0x50] sm:$0xff]  ;;  %v1675_v27 = vld [vmem:[#allocation2 + $0x58] sm:$0xff]  ;;  %v1678_v28 = vld [vmem:[#allocation2 + $0x60] sm:$0xff] }
  0x17   :  { %v1681_v29 = vld [vmem:[#allocation2 + $0x68] sm:$0xff]  ;;  %v1684_v30 = vld [vmem:[#allocation2 + $0x70] sm:$0xff]  ;;  %v1687_v31 = vld [vmem:[#allocation2 + $0x78] sm:$0xff] }
  0x18   :  { %306 = vmatpush.msra.mxu0 %v89_v5  ;;  %v1692_v33 = vld [vmem:[#allocation2 + $0x80] sm:$0xff]  ;;  %v1697_v35 = vld [vmem:[#allocation2 + $0x88] sm:$0xff]  ;;  %v1702_v37 = vld [vmem:[#allocation2 + $0x90] sm:$0xff] }
  0x19   :  { %2698 = vst [vmem:[#allocation14_spill] sm:$0xff] %v1692_v33  ;;  %v1707_v39 = vld [vmem:[#allocation2 + $0x98] sm:$0xff]  ;;  %v1712_v41 = vld [vmem:[#allocation2 + $0xa0] sm:$0xff]  ;;  %v1717_v43 = vld [vmem:[#allocation2 + $0xa8] sm:$0xff] }
  0x1a   :  { %307 = vmatpush.msra.mxu0 %v88_v6  ;;  %2699 = vst [vmem:[#allocation15_spill] sm:$0xff] %v1697_v35  ;;  %v1722_v45 = vld [vmem:[#allocation2 + $0xb0] sm:$0xff]  ;;  %v1727_v47 = vld [vmem:[#allocation2 + $0xb8] sm:$0xff]  ;;  %v1732_v49 = vld [vmem:[#allocation2 + $0xc0] sm:$0xff] }
  0x1b   :  { %2700 = vst [vmem:[#allocation16_spill] sm:$0xff] %v1702_v37  ;;  %v1737_v51 = vld [vmem:[#allocation2 + $0xc8] sm:$0xff]  ;;  %v1742_v53 = vld [vmem:[#allocation2 + $0xd0] sm:$0xff]  ;;  %v1747_v55 = vld [vmem:[#allocation2 + $0xd8] sm:$0xff] }
  0x1c   :  { %308 = vmatpush.msra.mxu0 %v87_v7  ;;  %v1752_v57 = vld [vmem:[#allocation2 + $0xe0] sm:$0xff]  ;;  %v1757_v59 = vld [vmem:[#allocation2 + $0xe8] sm:$0xff]  ;;  %v1762_v61 = vld [vmem:[#allocation2 + $0xf0] sm:$0xff] }
  0x1d   :  { %v1767_v63 = vld [vmem:[#allocation2 + $0xf8] sm:$0xff] }
  0x1e   :  { %309 = vmatpush.msra.mxu0 %v86_v8 }
  0x20   :  { %310 = vmatpush.msra.mxu0 %v85_v9 }
  0x22   :  { %311 = vmatpush.msra.mxu0 %v84_v10 }
  0x24   :  { %312 = vmatpush.msra.mxu0 %v83_v11 }
  0x26   :  { %313 = vmatpush.msra.mxu0 %v82_v12 }
  0x28   :  { %314 = vmatpush.msra.mxu0 %v81_v13 }
  0x2a   :  { %315 = vmatpush.msra.mxu0 %v80_v14 }
  0x2c   :  { %316 = vmatpush.msra.mxu0 %v79_v15 }
  0x2d   :  { %317 = vmatmul.f32.vlgmr.msra.gmra.mxu0 %v1642_v16 }
  0x35   :  { %320 = vmatmul.f32.gmra.mxu0 %v1645_v17 }
  0x3d   :  { %323 = vmatmul.f32.gmra.mxu0 %v1648_v18 }
  0x45   :  { %326 = vmatmul.f32.gmra.mxu0 %v1651_v19 }
  0x4d   :  { %329 = vmatmul.f32.gmra.mxu0 %v1654_v20 }
  0x55   :  { %332 = vmatmul.f32.gmra.mxu0 %v1657_v21 }
  0x5d   :  { %335 = vmatmul.f32.gmra.mxu0 %v1660_v22 }
  0x65   :  { %338 = vmatmul.f32.gmra.mxu0 %v1663_v23 }
  0x6d   :  { %341 = vmatmul.f32.gmra.mxu0 %v1666_v24 }
  0x75   :  { %344 = vmatmul.f32.gmra.mxu0 %v1669_v25 }
  0x7d   :  { %347 = vmatmul.f32.gmra.mxu0 %v1672_v26 }
  0x85   :  { %350 = vmatmul.f32.gmra.mxu0 %v1675_v27 }
  0x8d   :  { %353 = vmatmul.f32.gmra.mxu0 %v1678_v28 }
  0x95   :  { %356 = vmatmul.f32.gmra.mxu0 %v1681_v29 }
  0x9d   :  { %359 = vmatmul.f32.gmra.mxu0 %v1684_v30 }
  0xa5   :  { %362 = vmatmul.f32.gmra.mxu0 %v1687_v31 }
  0xaa   :  { %v1690_v32 = vpop.f32.mrf.mxu0 }
  0xad   :  { %365 = vmatmul.f32.gmra.mxu0 %v1692_v33 }
  0xb2   :  { %v1695_v34 = vpop.f32.mrf.mxu0 }
  0xb5   :  { %368 = vmatmul.f32.gmra.mxu0 %v1697_v35 }
  0xba   :  { %v1700_v36 = vpop.f32.mrf.mxu0 }
  0xbd   :  { %371 = vmatmul.f32.gmra.mxu0 %v1702_v37 }
  0xc2   :  { %v1705_v38 = vpop.f32.mrf.mxu0 }
  0xc5   :  { %374 = vmatmul.f32.gmra.mxu0 %v1707_v39 }
  0xca   :  { %v1710_v40 = vpop.f32.mrf.mxu0 }
  0xcd   :  { %377 = vmatmul.f32.gmra.mxu0 %v1712_v41 }
  0xd2   :  { %v1715_v42 = vpop.f32.mrf.mxu0 }
  0xd5   :  { %380 = vmatmul.f32.gmra.mxu0 %v1717_v43 }
  0xda   :  { %v1720_v44 = vpop.f32.mrf.mxu0 }
  0xdd   :  { %383 = vmatmul.f32.gmra.mxu0 %v1722_v45 }
  0xe2   :  { %v1725_v46 = vpop.f32.mrf.mxu0 }
  0xe5   :  { %386 = vmatmul.f32.gmra.mxu0 %v1727_v47 }
  0xea   :  { %v1730_v48 = vpop.f32.mrf.mxu0 }
  0xed   :  { %389 = vmatmul.f32.gmra.mxu0 %v1732_v49 }
  0xf2   :  { %v1735_v50 = vpop.f32.mrf.mxu0 }
  0xf3   :  { %2701 = vst [vmem:[#allocation17_spill] sm:$0xff] %v1735_v50 }
  0xf5   :  { %392 = vmatmul.f32.gmra.mxu0 %v1737_v51 }
  0xfa   :  { %v1740_v52 = vpop.f32.mrf.mxu0 }
  0xfb   :  { %2702 = vst [vmem:[#allocation18_spill] sm:$0xff] %v1740_v52 }
  0xfd   :  { %395 = vmatmul.f32.gmra.mxu0 %v1742_v53 }
 0x102   :  { %v1745_v54 = vpop.f32.mrf.mxu0 }
 0x103   :  { %2703 = vst [vmem:[#allocation19_spill] sm:$0xff] %v1745_v54 }
 0x105   :  { %398 = vmatmul.f32.gmra.mxu0 %v1747_v55 }
 0x10a   :  { %v1750_v56 = vpop.f32.mrf.mxu0 }
 0x10b   :  { %2704 = vst [vmem:[#allocation20_spill] sm:$0xff] %v1750_v56 }
 0x10d   :  { %401 = vmatmul.f32.gmra.mxu0 %v1752_v57 }
 0x112   :  { %v1755_v58 = vpop.f32.mrf.mxu0 }
 0x113   :  { %2705 = vst [vmem:[#allocation21_spill] sm:$0xff] %v1755_v58 }
 0x115   :  { %404 = vmatmul.f32.gmra.mxu0 %v1757_v59 }
 0x11a   :  { %v1760_v60 = vpop.f32.mrf.mxu0 }
 0x11b   :  { %2706 = vst [vmem:[#allocation22_spill] sm:$0xff] %v1760_v60 }
 0x11d   :  { %407 = vmatmul.f32.gmra.mxu0 %v1762_v61 }
 0x122   :  { %v1765_v62 = vpop.f32.mrf.mxu0 }
 0x123   :  { %2707 = vst [vmem:[#allocation23_spill] sm:$0xff] %v1765_v62  ;;  %414 = vmatpush.xpose.msra.mxu1 %v1765_v62  ;;  %1384 = vmatpush.xpose.msra.mxu3 %v1765_v62 }
 0x125   :  { %410 = vmatmul.f32.gmra.mxu0 %v1767_v63 }
 0x127   :  { %415 = vmatpush.xpose.msra.mxu1 %v1760_v60  ;;  %1385 = vmatpush.xpose.msra.mxu3 %v1760_v60 }
 0x12a   :  { %v1774_v0 = vpop.f32.mrf.mxu0 }
 0x12b   :  { %2708 = vst [vmem:[#allocation24_spill] sm:$0xff] %v1774_v0  ;;  %416 = vmatpush.xpose.msra.mxu1 %v1755_v58  ;;  %1386 = vmatpush.xpose.msra.mxu3 %v1755_v58 }
 0x12f   :  { %417 = vmatpush.xpose.msra.mxu1 %v1750_v56  ;;  %1387 = vmatpush.xpose.msra.mxu3 %v1750_v56 }
 0x132   :  { %v1780_v1 = vpop.f32.mrf.mxu0 }
 0x133   :  { %418 = vmatpush.xpose.msra.mxu1 %v1745_v54  ;;  %1388 = vmatpush.xpose.msra.mxu3 %v1745_v54 }
 0x137   :  { %419 = vmatpush.xpose.msra.mxu1 %v1740_v52  ;;  %1389 = vmatpush.xpose.msra.mxu3 %v1740_v52 }
 0x13a   :  { %v1786_v2 = vpop.f32.mrf.mxu0 }
 0x13b   :  { %420 = vmatpush.xpose.msra.mxu1 %v1735_v50  ;;  %1390 = vmatpush.xpose.msra.mxu3 %v1735_v50 }
 0x13f   :  { %421 = vmatpush.xpose.msra.mxu1 %v1730_v48  ;;  %1391 = vmatpush.xpose.msra.mxu3 %v1730_v48 }
 0x142   :  { %v1792_v3 = vpop.f32.mrf.mxu0 }
 0x143   :  { %422 = vmatpush.xpose.msra.mxu1 %v1725_v46  ;;  %1392 = vmatpush.xpose.msra.mxu3 %v1725_v46 }
 0x147   :  { %423 = vmatpush.xpose.msra.mxu1 %v1720_v44  ;;  %1393 = vmatpush.xpose.msra.mxu3 %v1720_v44 }
 0x14a   :  { %v1798_v4 = vpop.f32.mrf.mxu0 }
 0x14b   :  { %424 = vmatpush.xpose.msra.mxu1 %v1715_v42  ;;  %1394 = vmatpush.xpose.msra.mxu3 %v1715_v42 }
 0x14f   :  { %425 = vmatpush.xpose.msra.mxu1 %v1710_v40  ;;  %1395 = vmatpush.xpose.msra.mxu3 %v1710_v40 }
 0x152   :  { %v1804_v5 = vpop.f32.mrf.mxu0 }
 0x153   :  { %426 = vmatpush.xpose.msra.mxu1 %v1705_v38  ;;  %1396 = vmatpush.xpose.msra.mxu3 %v1705_v38 }
 0x157   :  { %427 = vmatpush.xpose.msra.mxu1 %v1700_v36  ;;  %1397 = vmatpush.xpose.msra.mxu3 %v1700_v36 }
 0x15a   :  { %v1810_v6 = vpop.f32.mrf.mxu0 }
 0x15b   :  { %428 = vmatpush.xpose.msra.mxu1 %v1695_v34  ;;  %1398 = vmatpush.xpose.msra.mxu3 %v1695_v34 }
 0x15f   :  { %429 = vmatpush.xpose.msra.mxu1 %v1690_v32  ;;  %1399 = vmatpush.xpose.msra.mxu3 %v1690_v32 }
 0x162   :  { %v1816_v7 = vpop.f32.mrf.mxu0  ;;  %430 = vmatmul.f32.vlgmr.msra.gmra.mxu1 %v1690_v32 }
 0x16a   :  { %v1819_v8 = vpop.f32.mrf.mxu0  ;;  %433 = vmatmul.f32.gmra.mxu1 %v1695_v34 }
 0x172   :  { %v1822_v9 = vpop.f32.mrf.mxu0  ;;  %436 = vmatmul.f32.gmra.mxu1 %v1700_v36 }
 0x173   :  { %2709 = vst [vmem:[#allocation25_spill] sm:$0xff] %v1822_v9 }
 0x17a   :  { %v1825_v10 = vpop.f32.mrf.mxu0  ;;  %439 = vmatmul.f32.gmra.mxu1 %v1705_v38 }
 0x17b   :  { %2710 = vst [vmem:[#allocation26_spill] sm:$0xff] %v1825_v10 }
 0x182   :  { %v1828_v11 = vpop.f32.mrf.mxu0  ;;  %442 = vmatmul.f32.gmra.mxu1 %v1710_v40 }
 0x183   :  { %2711 = vst [vmem:[#allocation27_spill] sm:$0xff] %v1828_v11  ;;  %511 = vmatmul.f32.vlgmr.msra.gmra.mxu3 %v1828_v11 }
 0x18a   :  { %v402_v12 = vpop.f32.mrf.mxu0  ;;  %445 = vmatmul.f32.gmra.mxu1 %v1715_v42 }
 0x18b   :  { %514 = vmatmul.f32.gmra.mxu3 %v402_v12 }
 0x192   :  { %v1833_v13 = vpop.f32.mrf.mxu0  ;;  %448 = vmatmul.f32.gmra.mxu1 %v1720_v44 }
 0x193   :  { %517 = vmatmul.f32.gmra.mxu3 %v1833_v13 }
 0x19a   :  { %v1837_v14 = vpop.f32.mrf.mxu0  ;;  %451 = vmatmul.f32.gmra.mxu1 %v1725_v46 }
 0x19b   :  { %520 = vmatmul.f32.gmra.mxu3 %v1837_v14 }
 0x1a2   :  { %v1841_v15 = vpop.f32.mrf.mxu0  ;;  %454 = vmatmul.f32.gmra.mxu1 %v1730_v48 }
 0x1a3   :  { %523 = vmatmul.f32.gmra.mxu3 %v1841_v15  ;;  %527 = vmatpush.xpose.msra.mxu2 %v1841_v15 }
 0x1a4   :  { %1400 = vmatpush.xpose.msrb.mxu3 %v1841_v15 }
 0x1a7   :  { %528 = vmatpush.xpose.msra.mxu2 %v1837_v14 }
 0x1a8   :  { %1401 = vmatpush.xpose.msrb.mxu3 %v1837_v14 }
 0x1aa   :  { %457 = vmatmul.f32.gmra.mxu1 %v1735_v50 }
 0x1ab   :  { %529 = vmatpush.xpose.msra.mxu2 %v1833_v13 }
 0x1ac   :  { %1402 = vmatpush.xpose.msrb.mxu3 %v1833_v13 }
 0x1af   :  { %530 = vmatpush.xpose.msra.mxu2 %v402_v12 }
 0x1b0   :  { %1403 = vmatpush.xpose.msrb.mxu3 %v402_v12 }
 0x1b2   :  { %460 = vmatmul.f32.gmra.mxu1 %v1740_v52 }
 0x1b3   :  { %531 = vmatpush.xpose.msra.mxu2 %v1828_v11 }
 0x1b4   :  { %1404 = vmatpush.xpose.msrb.mxu3 %v1828_v11  ;;  %v95_v11 = vlaneseq }
 0x1b7   :  { %532 = vmatpush.xpose.msra.mxu2 %v1825_v10 }
 0x1b8   :  { %1405 = vmatpush.xpose.msrb.mxu3 %v1825_v10 }
 0x1ba   :  { %463 = vmatmul.f32.gmra.mxu1 %v1745_v54  ;;  %v1889_v54 = vand.u32 127, %v95_v11 }
 0x1bb   :  { %533 = vmatpush.xpose.msra.mxu2 %v1822_v9 }
 0x1bc   :  { %1406 = vmatpush.xpose.msrb.mxu3 %v1822_v9  ;;  %2713 = vst [vmem:[#allocation29_spill] sm:$0xff] %v1889_v54  ;;  %v291_v50 = vcvt.s32.f32 %v1889_v54 }
 0x1be   :  { %v293_v33 = vadd.f32 0.5, %v291_v50 }
 0x1bf   :  { %534 = vmatpush.xpose.msra.mxu2 %v1819_v8 }
 0x1c0   :  { %1407 = vmatpush.xpose.msrb.mxu3 %v1819_v8 }
 0x1c2   :  { %466 = vmatmul.f32.gmra.mxu1 %v1750_v56 }
 0x1c3   :  { %535 = vmatpush.xpose.msra.mxu2 %v1816_v7 }
 0x1c4   :  { %1408 = vmatpush.xpose.msrb.mxu3 %v1816_v7 }
 0x1c7   :  { %536 = vmatpush.xpose.msra.mxu2 %v1810_v6 }
 0x1c8   :  { %1409 = vmatpush.xpose.msrb.mxu3 %v1810_v6 }
 0x1ca   :  { %469 = vmatmul.f32.gmra.mxu1 %v1755_v58  ;;  %v1880_v58 = vshrl.u32 %v95_v11, 7 }
 0x1cb   :  { %537 = vmatpush.xpose.msra.mxu2 %v1804_v5 }
 0x1cc   :  { %1410 = vmatpush.xpose.msrb.mxu3 %v1804_v5  ;;  %v1892_v52 = vadd.s32 16, %v1880_v58  ;;  %v1899_v10 = vadd.s32 24, %v1880_v58  ;;  %v131_v11 = vcvt.s32.f32 %v1880_v58 }
 0x1ce   :  { %2714 = vst [vmem:[#allocation30_spill] sm:$0xff] %v1892_v52  ;;  %v133_v9 = vcvt.s32.f32 %v1892_v52 }
 0x1cf   :  { %538 = vmatpush.xpose.msra.mxu2 %v1798_v4  ;;  %2715 = vst [vmem:[#allocation31_spill] sm:$0xff] %v1899_v10 }
 0x1d0   :  { %1411 = vmatpush.xpose.msrb.mxu3 %v1798_v4 }
 0x1d2   :  { %472 = vmatmul.f32.gmra.mxu1 %v1760_v60  ;;  %v1886_v60 = vadd.s32 8, %v1880_v58 }
 0x1d3   :  { %539 = vmatpush.xpose.msra.mxu2 %v1792_v3 }
 0x1d4   :  { %1412 = vmatpush.xpose.msrb.mxu3 %v1792_v3  ;;  %2712 = vst [vmem:[#allocation28_spill] sm:$0xff] %v1886_v60 }
 0x1d7   :  { %540 = vmatpush.xpose.msra.mxu2 %v1786_v2 }
 0x1d8   :  { %1413 = vmatpush.xpose.msrb.mxu3 %v1786_v2 }
 0x1da   :  { %475 = vmatmul.f32.gmra.mxu1 %v1765_v62  ;;  %v132_v62 = vcvt.s32.f32 %v1886_v60  ;;  %v134_v60 = vcvt.s32.f32 %v1899_v10 }
 0x1db   :  { %541 = vmatpush.xpose.msra.mxu2 %v1780_v1 }
 0x1dc   :  { %1414 = vmatpush.xpose.msrb.mxu3 %v1780_v1  ;;  %v166_v35 = vadd.f32 0.5, %v134_v60 }
 0x1df   :  { %v1882_v56 = vpop.f32.mrf.mxu1  ;;  %542 = vmatpush.xpose.msra.mxu2 %v1774_v0 }
 0x1e0   :  { %1415 = vmatpush.xpose.msrb.mxu3 %v1774_v0 }
 0x1e2   :  { %478 = vmatmul.f32.gmra.mxu1 %v1774_v0  ;;  %543 = vmatmul.f32.vlgmr.msra.gmra.mxu2 %v1690_v32  ;;  %v164_v32 = vadd.f32 0.5, %v132_v62  ;;  %v163_v0 = vadd.f32 0.5, %v131_v11  ;;  %v295_v62 = vmul.f32 0.125, %v293_v33  ;;  %v1918_v11 = vadd.s32 40, %v1880_v58 }
 0x1e3   :  { %627 = vmatmul.f32.vlgmr.msrb.gmra.mxu3 %v402_v12 }
 0x1e4   :  { %998 = vmatpush.msra.mxu3 %v1687_v31  ;;  %v1906_v31 = vadd.s32 32, %v1880_v58  ;;  %v196_v54 = vmul.f32 0.125, %v164_v32  ;;  %2717 = vst [vmem:[#allocation33_spill] sm:$0xff] %v1918_v11  ;;  %v297_v32 = vfloor.f32 %v295_v62 }
 0x1e6   :  { %999 = vmatpush.msra.mxu3 %v1684_v30  ;;  %2716 = vst [vmem:[#allocation32_spill] sm:$0xff] %v1906_v31  ;;  %v165_v30 = vadd.f32 0.5, %v133_v9  ;;  %v135_v52 = vcvt.s32.f32 %v1906_v31  ;;  %v198_v9 = vmul.f32 0.125, %v166_v35  ;;  %v136_v35 = vcvt.s32.f32 %v1918_v11 }
 0x1e7   :  { %v434_v12 = vpop.f32.mrf.mxu1  ;;  %v2206_v31 = vadd.s32 208, %v1880_v58 }
 0x1e8   :  { %1000 = vmatpush.msra.mxu3 %v1681_v29  ;;  %v195_v29 = vmul.f32 0.125, %v163_v0  ;;  %v197_v10 = vmul.f32 0.125, %v165_v30  ;;  %v167_v37 = vadd.f32 0.5, %v135_v52  ;;  %v706_v60 = vmax.f32 %v434_v12, 0.0 }
 0x1ea   :  { %1001 = vmatpush.msra.mxu3 %v1678_v28  ;;  %481 = vmatmul.f32.gmra.mxu1 %v1780_v1  ;;  %v228_v28 = vfloor.f32 %v196_v54 }
 0x1eb   :  { %546 = vmatmul.f32.gmra.mxu2 %v1695_v34  ;;  %630 = vmatmul.f32.gmra.mxu3 %v1833_v13  ;;  %v227_v34 = vfloor.f32 %v195_v29  ;;  %v229_v13 = vfloor.f32 %v197_v10  ;;  %v168_v10 = vadd.f32 0.5, %v136_v35 }
 0x1ec   :  { %1002 = vmatpush.msra.mxu3 %v1675_v27  ;;  %v199_v27 = vmul.f32 0.125, %v167_v37  ;;  %v1923_v33 = vcvt.f32.s32 %v228_v28 }
 0x1ed   :  { %v1928_v52 = vcvt.f32.s32 %v227_v34  ;;  %v1932_v54 = vcvt.f32.s32 %v229_v13 }
 0x1ee   :  { %1003 = vmatpush.msra.mxu3 %v1672_v26  ;;  %2718 = vst [vmem:[#allocation34_spill] sm:$0xff] %v1923_v33  ;;  %v230_v26 = vfloor.f32 %v198_v9  ;;  %v231_v0 = vfloor.f32 %v199_v27 }
 0x1ef   :  { %v437_v50 = vpop.f32.mrf.mxu1  ;;  %2719 = vst [vmem:[#allocation35_spill] sm:$0xff] %v1928_v52 }
 0x1f0   :  { %1004 = vmatpush.msra.mxu3 %v1669_v25  ;;  %v1930_v25 = vcvt.f32.s32 %v297_v32  ;;  %2720 = vst [vmem:[#allocation36_spill] sm:$0xff] %v1932_v54  ;;  %v708_v30 = vmax.f32 %v437_v50, 0.0  ;;  %v1950_v29 = vcvt.f32.s32 %v231_v0 }
 0x1f2   :  { %484 = vmatmul.f32.gmra.mxu1 %v1786_v2  ;;  %1005 = vmatpush.msra.mxu3 %v1666_v24  ;;  %vm642_vm0 = vcmp.eq.s32.totalorder %v1923_v33, %v1930_v25  ;;  %v704_v24 = vmax.f32 %v1882_v56, 0.0  ;;  %vm640_vm1 = vcmp.eq.s32.totalorder %v1928_v52, %v1930_v25  ;;  %vm644_vm2 = vcmp.eq.s32.totalorder %v1932_v54, %v1930_v25 }
 0x1f3   :  { %549 = vmatmul.f32.gmra.mxu2 %v1700_v36  ;;  %633 = vmatmul.f32.gmra.mxu3 %v1837_v14  ;;  %v1937_v36 = vcvt.f32.s32 %v230_v26  ;;  %v1940_v14 = vadd.s32 48, %v1880_v58  ;;  %2723 = vst [vmem:[#allocation39_spill] sm:$0xff] %v1950_v29  ;;  %v772_v28 = vsel %vm644_vm2, %v708_v30, 0.0  ;;  %vm648_vm4 = vcmp.eq.s32.totalorder %v1950_v29, %v1930_v25 }
 0x1f4   :  { %1006 = vmatpush.msra.mxu3 %v1663_v23  ;;  %v770_v23 = vsel %vm642_vm0, %v706_v60, 0.0  ;;  %v768_v62 = vsel %vm640_vm1, %v704_v24, 0.0  ;;  %v1974_v24 = vadd.s32 64, %v1880_v58 }
 0x1f5   :  { %2721 = vst [vmem:[#allocation37_spill] sm:$0xff] %v1937_v36  ;;  %vm646_vm3 = vcmp.eq.s32.totalorder %v1937_v36, %v1930_v25  ;;  %v137_v56 = vcvt.s32.f32 %v1940_v14  ;;  %v832_v50 = vadd.f32 %v770_v23, %v768_v62 }
 0x1f6   :  { %2722 = vst [vmem:[#allocation38_spill] sm:$0xff] %v1940_v14  ;;  %1007 = vmatpush.msra.mxu3 %v1660_v22  ;;  %v200_v22 = vmul.f32 0.125, %v168_v10  ;;  %v2212_v14 = vadd.s32 216, %v1880_v58 }
 0x1f7   :  { %v440_v37 = vpop.f32.mrf.mxu1  ;;  %v169_v13 = vadd.f32 0.5, %v137_v56  ;;  %2726 = vst [vmem:[#allocation42_spill] sm:$0xff] %v1974_v24  ;;  %v1988_v56 = vadd.s32 72, %v1880_v58 }
 0x1f8   :  { %v710_v12 = vmax.f32 %v440_v37, 0.0  ;;  %1008 = vmatpush.msra.mxu3 %v1657_v21  ;;  %v232_v32 = vfloor.f32 %v200_v22 }
 0x1f9   :  { %2728 = vst [vmem:[#allocation44_spill] sm:$0xff] %v1988_v56 }
 0x1fa   :  { %487 = vmatmul.f32.gmra.mxu1 %v1792_v3  ;;  %v774_v9 = vsel %vm646_vm3, %v710_v12, 0.0  ;;  %1009 = vmatpush.msra.mxu3 %v1654_v20  ;;  %v1966_v60 = vcvt.f32.s32 %v232_v32  ;;  %v201_v20 = vmul.f32 0.125, %v169_v13  ;;  %v139_v12 = vcvt.s32.f32 %v1974_v24 }
 0x1fb   :  { %552 = vmatmul.f32.gmra.mxu2 %v1705_v38  ;;  %636 = vmatmul.f32.gmra.mxu3 %v1841_v15  ;;  %v833_v38 = vadd.f32 %v832_v50, %v772_v28  ;;  %v1961_v15 = vadd.s32 56, %v1880_v58  ;;  %v140_v50 = vcvt.s32.f32 %v1988_v56 }
 0x1fc   :  { %1010 = vmatpush.msra.mxu3 %v1651_v19  ;;  %2725 = vst [vmem:[#allocation41_spill] sm:$0xff] %v1966_v60  ;;  %vm650_vm5 = vcmp.eq.s32.totalorder %v1966_v60, %v1930_v25  ;;  %v233_v19 = vfloor.f32 %v201_v20 }
 0x1fd   :  { %2724 = vst [vmem:[#allocation40_spill] sm:$0xff] %v1961_v15  ;;  %v834_v26 = vadd.f32 %v833_v38, %v774_v9  ;;  %v138_v0 = vcvt.s32.f32 %v1961_v15  ;;  %v2002_v38 = vadd.s32 80, %v1880_v58 }
 0x1fe   :  { %1011 = vmatpush.msra.mxu3 %v1648_v18  ;;  %v1980_v18 = vcvt.f32.s32 %v233_v19 }
 0x1ff   :  { %v443_v34 = vpop.f32.mrf.mxu1  ;;  %v170_v10 = vadd.f32 0.5, %v138_v0  ;;  %2730 = vst [vmem:[#allocation46_spill] sm:$0xff] %v2002_v38  ;;  %v141_v13 = vcvt.s32.f32 %v2002_v38  ;;  %v2731_v0 = vld [vmem:[#allocation16_spill] sm:$0xff] }
 0x200   :  { %v712_v27 = vmax.f32 %v443_v34, 0.0  ;;  %1012 = vmatpush.msra.mxu3 %v1645_v17  ;;  %2727 = vst [vmem:[#allocation43_spill] sm:$0xff] %v1980_v18  ;;  %vm652_vm6 = vcmp.eq.s32.totalorder %v1980_v18, %v1930_v25 }
 0x201   :  { %v202_v23 = vmul.f32 0.125, %v170_v10  ;;  %v2030_v10 = vadd.s32 96, %v1880_v58 }
 0x202   :  { %v776_v35 = vsel %vm648_vm4, %v712_v27, 0.0  ;;  %490 = vmatmul.f32.gmra.mxu1 %v1798_v4  ;;  %1013 = vmatpush.msra.mxu3 %v1642_v16 }
 0x203   :  { %555 = vmatmul.f32.gmra.mxu2 %v1710_v40  ;;  %v835_v21 = vadd.f32 %v834_v26, %v776_v35  ;;  %v234_v16 = vfloor.f32 %v202_v23  ;;  %v2016_v26 = vadd.s32 88, %v1880_v58  ;;  %v2735_v23 = vld [vmem:[#allocation17_spill] sm:$0xff] }
 0x204   :  { %1027 = vmatpush.msrb.mxu3 %v1767_v63  ;;  %v171_v63 = vadd.f32 0.5, %v139_v12 }
 0x205   :  { %v142_v20 = vcvt.s32.f32 %v2016_v26 }
 0x206   :  { %1028 = vmatpush.msrb.mxu3 %v1762_v61  ;;  %v1994_v61 = vcvt.f32.s32 %v234_v16  ;;  %v203_v28 = vmul.f32 0.125, %v171_v63  ;;  %v143_v63 = vcvt.s32.f32 %v2030_v10 }
 0x207   :  { %v446_v37 = vpop.f32.mrf.mxu1 }
 0x208   :  { %v714_v40 = vmax.f32 %v446_v37, 0.0  ;;  %1029 = vmatpush.msrb.mxu3 %v1757_v59  ;;  %2729 = vst [vmem:[#allocation45_spill] sm:$0xff] %v1994_v61  ;;  %vm654_vm7 = vcmp.eq.s32.totalorder %v1994_v61, %v1930_v25  ;;  %v2732_v37 = vld [vmem:[#allocation15_spill] sm:$0xff] }
 0x20a   :  { %v778_v30 = vsel %vm650_vm5, %v714_v40, 0.0  ;;  %493 = vmatmul.f32.gmra.mxu1 %v1804_v5  ;;  %1030 = vmatpush.msrb.mxu3 %v1752_v57  ;;  %v172_v57 = vadd.f32 0.5, %v140_v50 }
 0x20b   :  { %558 = vmatmul.f32.gmra.mxu2 %v1715_v42  ;;  %v836_v17 = vadd.f32 %v835_v21, %v778_v30 }
 0x20c   :  { %1031 = vmatpush.msrb.mxu3 %v1747_v55  ;;  %v235_v55 = vfloor.f32 %v203_v28  ;;  %v204_v32 = vmul.f32 0.125, %v172_v57  ;;  %v2041_v28 = vadd.s32 104, %v1880_v58  ;;  %v2737_v57 = vld [vmem:[#allocation18_spill] sm:$0xff] }
 0x20e   :  { %1032 = vmatpush.msrb.mxu3 %v1742_v53  ;;  %v2008_v53 = vcvt.f32.s32 %v235_v55  ;;  %v2736_v55 = vld [vmem:[#allocation26_spill] sm:$0xff] }
 0x20f   :  { %v449_v22 = vpop.f32.mrf.mxu1 }
 0x210   :  { %v716_v42 = vmax.f32 %v449_v22, 0.0  ;;  %1033 = vmatpush.msrb.mxu3 %v1737_v51  ;;  %vm656_vm8 = vcmp.eq.s32.totalorder %v2008_v53, %v1930_v25 }
 0x212   :  { %v780_v62 = vsel %vm652_vm6, %v716_v42, 0.0  ;;  %496 = vmatmul.f32.gmra.mxu1 %v1810_v6  ;;  %1034 = vmatpush.msrb.mxu3 %v1732_v49  ;;  %v173_v49 = vadd.f32 0.5, %v141_v13 }
 0x213   :  { %561 = vmatmul.f32.gmra.mxu2 %v1720_v44  ;;  %v837_v59 = vadd.f32 %v836_v17, %v780_v62  ;;  %v2734_v17 = vld [vmem:[#allocation25_spill] sm:$0xff] }
 0x214   :  { %1035 = vmatpush.msrb.mxu3 %v1727_v47  ;;  %v236_v47 = vfloor.f32 %v204_v32  ;;  %v205_v21 = vmul.f32 0.125, %v173_v49  ;;  %v144_v32 = vcvt.s32.f32 %v2041_v28  ;;  %v2051_v49 = vadd.s32 112, %v1880_v58 }
 0x216   :  { %1036 = vmatpush.msrb.mxu3 %v1722_v45  ;;  %v2022_v45 = vcvt.f32.s32 %v236_v47  ;;  %v176_v47 = vadd.f32 0.5, %v144_v32 }
 0x217   :  { %v452_v9 = vpop.f32.mrf.mxu1 }
 0x218   :  { %v718_v44 = vmax.f32 %v452_v9, 0.0  ;;  %1037 = vmatpush.msrb.mxu3 %v1717_v43  ;;  %vm658_vm9 = vcmp.eq.s32.totalorder %v2022_v45, %v1930_v25 }
 0x21a   :  { %v782_v34 = vsel %vm654_vm7, %v718_v44, 0.0  ;;  %499 = vmatmul.f32.gmra.mxu1 %v1816_v7  ;;  %1038 = vmatpush.msrb.mxu3 %v1712_v41  ;;  %v174_v41 = vadd.f32 0.5, %v142_v20 }
 0x21b   :  { %564 = vmatmul.f32.gmra.mxu2 %v1725_v46  ;;  %v838_v51 = vadd.f32 %v837_v59, %v782_v34  ;;  %v175_v59 = vadd.f32 0.5, %v143_v63 }
 0x21c   :  { %1039 = vmatpush.msrb.mxu3 %v1707_v39  ;;  %v237_v39 = vfloor.f32 %v205_v21  ;;  %v206_v16 = vmul.f32 0.125, %v174_v41 }
 0x21e   :  { %1040 = vmatpush.msrb.mxu3 %v2731_v0  ;;  %v2035_v22 = vcvt.f32.s32 %v237_v39  ;;  %v238_v62 = vfloor.f32 %v206_v16  ;;  %v208_v0 = vmul.f32 0.125, %v176_v47 }
 0x21f   :  { %v455_v27 = vpop.f32.mrf.mxu1 }
 0x220   :  { %v720_v46 = vmax.f32 %v455_v27, 0.0  ;;  %1041 = vmatpush.msrb.mxu3 %v2732_v37  ;;  %vm660_vm10 = vcmp.eq.s32.totalorder %v2035_v22, %v1930_v25  ;;  %v2045_v34 = vcvt.f32.s32 %v238_v62  ;;  %v145_v37 = vcvt.s32.f32 %v2051_v49 }
 0x221   :  { %v240_v39 = vfloor.f32 %v208_v0 }
 0x222   :  { %v784_v35 = vsel %vm656_vm8, %v720_v46, 0.0  ;;  %502 = vmatmul.f32.gmra.mxu1 %v1819_v8  ;;  %vm662_vm11 = vcmp.eq.s32.totalorder %v2045_v34, %v1930_v25  ;;  %v177_v41 = vadd.f32 0.5, %v145_v37  ;;  %v2742_v37 = vld [vmem:[#allocation29_spill] sm:$0xff] }
 0x223   :  { %567 = vmatmul.f32.gmra.mxu2 %v1730_v48  ;;  %v839_v43 = vadd.f32 %v838_v51, %v784_v35  ;;  %v2733_v48 = vld [vmem:[#allocation14_spill] sm:$0xff]  ;;  %v207_v51 = vmul.f32 0.125, %v175_v59  ;;  %v2063_v16 = vcvt.f32.s32 %v240_v39  ;;  %2757 = vst [vmem:[#allocation29_spill] sm:$0xff] %v2206_v31 }
 0x224   :  { %1042 = vmatpush.msrb.mxu3 %v2733_v48  ;;  %v2060_v48 = vadd.s32 120, %v1880_v58  ;;  %v209_v63 = vmul.f32 0.125, %v177_v41 }
 0x225   :  { %v239_v27 = vfloor.f32 %v207_v51  ;;  %vm666_vm13 = vcmp.eq.s32.totalorder %v2063_v16, %v1930_v25 }
 0x226   :  { %v241_v59 = vfloor.f32 %v209_v63 }
 0x227   :  { %v458_v19 = vpop.f32.mrf.mxu1  ;;  %v2054_v20 = vcvt.f32.s32 %v239_v27 }
 0x228   :  { %v722_v40 = vmax.f32 %v458_v19, 0.0  ;;  %v2069_v32 = vcvt.f32.s32 %v241_v59 }
 0x229   :  { %vm664_vm12 = vcmp.eq.s32.totalorder %v2054_v20, %v1930_v25 }
 0x22a   :  { %v786_v30 = vsel %vm658_vm9, %v722_v40, 0.0  ;;  %505 = vmatmul.f32.gmra.mxu1 %v2734_v17  ;;  %vm668_vm14 = vcmp.eq.s32.totalorder %v2069_v32, %v1930_v25 }
 0x22b   :  { %570 = vmatmul.f32.gmra.mxu2 %v2735_v23  ;;  %v840_v12 = vadd.f32 %v839_v43, %v786_v30  ;;  %v2738_v43 = vld [vmem:[#allocation19_spill] sm:$0xff]  ;;  %v2739_v23 = vld [vmem:[#allocation20_spill] sm:$0xff] }
 0x22f   :  { %v461_v42 = vpop.f32.mrf.mxu1 }
 0x230   :  { %v724_v50 = vmax.f32 %v461_v42, 0.0  ;;  %v146_v42 = vcvt.s32.f32 %v2060_v48 }
 0x232   :  { %v788_v9 = vsel %vm660_vm10, %v724_v50, 0.0  ;;  %508 = vmatmul.f32.gmra.mxu1 %v2736_v55  ;;  %v178_v50 = vadd.f32 0.5, %v146_v42 }
 0x233   :  { %573 = vmatmul.f32.gmra.mxu2 %v2737_v57  ;;  %v841_v44 = vadd.f32 %v840_v12, %v788_v9 }
 0x237   :  { %v464_v13 = vpop.f32.mrf.mxu1 }
 0x238   :  { %v726_v46 = vmax.f32 %v464_v13, 0.0  ;;  %v210_v13 = vmul.f32 0.125, %v178_v50 }
 0x23a   :  { %v790_v35 = vsel %vm662_vm11, %v726_v46, 0.0  ;;  %v242_v47 = vfloor.f32 %v210_v13 }
 0x23b   :  { %576 = vmatmul.f32.gmra.mxu2 %v2738_v43  ;;  %v842_v21 = vadd.f32 %v841_v44, %v790_v35  ;;  %v2740_v44 = vld [vmem:[#allocation21_spill] sm:$0xff]  ;;  %v2741_v43 = vld [vmem:[#allocation22_spill] sm:$0xff] }
 0x23c   :  { %v2074_v0 = vcvt.f32.s32 %v242_v47 }
 0x23e   :  { %vm670_vm15 = vcmp.eq.s32.totalorder %v2074_v0, %v1930_v25 }
 0x23f   :  { %v467_v19 = vpop.f32.mrf.mxu1 }
 0x240   :  { %v728_v40 = vmax.f32 %v467_v19, 0.0  ;;  %v130_v19 = vadd.s32 128, %v2742_v37 }
 0x242   :  { %v792_v30 = vsel %vm664_vm12, %v728_v40, 0.0  ;;  %v292_v40 = vcvt.s32.f32 %v130_v19 }
 0x243   :  { %579 = vmatmul.f32.gmra.mxu2 %v2739_v23  ;;  %v843_v12 = vadd.f32 %v842_v21, %v792_v30  ;;  %v2743_v23 = vld [vmem:[#allocation23_spill] sm:$0xff] }
 0x244   :  { %v294_v63 = vadd.f32 0.5, %v292_v40  ;;  %2758 = vst [vmem:[#allocation23_spill] sm:$0xff] %v2212_v14 }
 0x246   :  { %v296_v42 = vmul.f32 0.125, %v294_v63 }
 0x247   :  { %v470_v62 = vpop.f32.mrf.mxu1 }
 0x248   :  { %v730_v9 = vmax.f32 %v470_v62, 0.0  ;;  %v2744_v62 = vld [vmem:[#allocation24_spill] sm:$0xff]  ;;  %v298_v59 = vfloor.f32 %v296_v42 }
 0x24a   :  { %v794_v57 = vsel %vm666_vm13, %v730_v9, 0.0  ;;  %v2083_v9 = vcvt.f32.s32 %v298_v59 }
 0x24b   :  { %582 = vmatmul.f32.gmra.mxu2 %v2740_v44  ;;  %v844_v51 = vadd.f32 %v843_v12, %v794_v57 }
 0x24c   :  { %vm641_vm0 = vcmp.eq.s32.totalorder %v1928_v52, %v2083_v9  ;;  %vm643_vm1 = vcmp.eq.s32.totalorder %v1923_v33, %v2083_v9  ;;  %vm645_vm2 = vcmp.eq.s32.totalorder %v1932_v54, %v2083_v9  ;;  %vm647_vm3 = vcmp.eq.s32.totalorder %v1937_v36, %v2083_v9 }
 0x24d   :  { %vm649_vm4 = vcmp.eq.s32.totalorder %v1950_v29, %v2083_v9  ;;  %vm651_vm5 = vcmp.eq.s32.totalorder %v1966_v60, %v2083_v9  ;;  %vm653_vm6 = vcmp.eq.s32.totalorder %v1980_v18, %v2083_v9  ;;  %vm655_vm7 = vcmp.eq.s32.totalorder %v1994_v61, %v2083_v9 }
 0x24e   :  { %vm657_vm8 = vcmp.eq.s32.totalorder %v2008_v53, %v2083_v9  ;;  %vm659_vm9 = vcmp.eq.s32.totalorder %v2022_v45, %v2083_v9  ;;  %vm661_vm10 = vcmp.eq.s32.totalorder %v2035_v22, %v2083_v9  ;;  %vm663_vm11 = vcmp.eq.s32.totalorder %v2045_v34, %v2083_v9 }
 0x24f   :  { %v473_v27 = vpop.f32.mrf.mxu1  ;;  %vm665_vm12 = vcmp.eq.s32.totalorder %v2054_v20, %v2083_v9  ;;  %vm667_vm13 = vcmp.eq.s32.totalorder %v2063_v16, %v2083_v9  ;;  %v2236_v18 = vadd.s32 224, %v1880_v58 }
 0x250   :  { %v732_v46 = vmax.f32 %v473_v27, 0.0 }
 0x251   :  { %2759 = vst [vmem:[#allocation24_spill] sm:$0xff] %v2236_v18 }
 0x252   :  { %v796_v35 = vsel %vm668_vm14, %v732_v46, 0.0  ;;  %vm669_vm14 = vcmp.eq.s32.totalorder %v2069_v32, %v2083_v9 }
 0x253   :  { %585 = vmatmul.f32.gmra.mxu2 %v2741_v43  ;;  %v845_v21 = vadd.f32 %v844_v51, %v796_v35 }
 0x257   :  { %v476_v39 = vpop.f32.mrf.mxu1 }
 0x258   :  { %v734_v41 = vmax.f32 %v476_v39, 0.0 }
 0x25a   :  { %v798_v30 = vsel %vm670_vm15, %v734_v41, 0.0  ;;  %vm671_vm15 = vcmp.eq.s32.totalorder %v2074_v0, %v2083_v9 }
 0x25b   :  { %588 = vmatmul.f32.gmra.mxu2 %v2743_v23  ;;  %v2080_v12 = vadd.f32 %v845_v21, %v798_v30 }
 0x263   :  { %591 = vmatmul.f32.gmra.mxu2 %v2744_v62 }
 0x265   :  { %v544_v50 = vpop.f32.mrf.mxu2 }
 0x266   :  { %v705_v57 = vmax.f32 %v544_v50, 0.0 }
 0x268   :  { %v769_v13 = vsel %vm641_vm0, %v705_v57, 0.0 }
 0x26b   :  { %594 = vmatmul.f32.gmra.mxu2 %v1780_v1 }
 0x26e   :  { %v547_v44 = vpop.f32.mrf.mxu2 }
 0x26f   :  { %v707_v51 = vmax.f32 %v547_v44, 0.0 }
 0x271   :  { %v771_v27 = vsel %vm643_vm1, %v707_v51, 0.0 }
 0x272   :  { %v869_v47 = vadd.f32 %v771_v27, %v769_v13 }
 0x273   :  { %597 = vmatmul.f32.gmra.mxu2 %v1786_v2 }
 0x276   :  { %v550_v46 = vpop.f32.mrf.mxu2 }
 0x277   :  { %v709_v35 = vmax.f32 %v550_v46, 0.0 }
 0x279   :  { %v773_v1 = vsel %vm645_vm2, %v709_v35, 0.0 }
 0x27a   :  { %v870_v43 = vadd.f32 %v869_v47, %v773_v1 }
 0x27b   :  { %600 = vmatmul.f32.gmra.mxu2 %v1792_v3 }
 0x27e   :  { %v553_v21 = vpop.f32.mrf.mxu2 }
 0x27f   :  { %v711_v19 = vmax.f32 %v553_v21, 0.0 }
 0x281   :  { %v775_v39 = vsel %vm647_vm3, %v711_v19, 0.0 }
 0x282   :  { %v871_v41 = vadd.f32 %v870_v43, %v775_v39  ;;  %v2117_v39 = vpop.f32.mrf.mxu1 }
 0x283   :  { %603 = vmatmul.f32.gmra.mxu2 %v1798_v4 }
 0x286   :  { %v556_v40 = vpop.f32.mrf.mxu2 }
 0x287   :  { %v713_v2 = vmax.f32 %v556_v40, 0.0  ;;  %v2745_v40 = vld [vmem:[#allocation27_spill] sm:$0xff] }
 0x289   :  { %v777_v30 = vsel %vm649_vm4, %v713_v2, 0.0 }
 0x28a   :  { %v872_v23 = vadd.f32 %v871_v41, %v777_v30 }
 0x28b   :  { %606 = vmatmul.f32.gmra.mxu2 %v1804_v5 }
 0x28e   :  { %v559_v63 = vpop.f32.mrf.mxu2 }
 0x28f   :  { %v715_v3 = vmax.f32 %v559_v63, 0.0  ;;  %v2122_v63 = vpop.f32.mrf.mxu1 }
 0x291   :  { %v779_v42 = vsel %vm651_vm5, %v715_v3, 0.0 }
 0x292   :  { %v873_v62 = vadd.f32 %v872_v23, %v779_v42 }
 0x293   :  { %609 = vmatmul.f32.gmra.mxu2 %v1810_v6 }
 0x296   :  { %v562_v59 = vpop.f32.mrf.mxu2 }
 0x297   :  { %v717_v4 = vmax.f32 %v562_v59, 0.0  ;;  %v2126_v59 = vpop.f32.mrf.mxu1 }
 0x299   :  { %v781_v50 = vsel %vm653_vm6, %v717_v4, 0.0 }
 0x29a   :  { %v874_v57 = vadd.f32 %v873_v62, %v781_v50 }
 0x29b   :  { %612 = vmatmul.f32.gmra.mxu2 %v1816_v7 }
 0x29e   :  { %v565_v44 = vpop.f32.mrf.mxu2 }
 0x29f   :  { %v719_v5 = vmax.f32 %v565_v44, 0.0 }
 0x2a1   :  { %v783_v51 = vsel %vm655_vm7, %v719_v5, 0.0 }
 0x2a2   :  { %v875_v13 = vadd.f32 %v874_v57, %v783_v51  ;;  %v2131_v57 = vadd.s32 128, %v1880_v58 }
 0x2a3   :  { %615 = vmatmul.f32.gmra.mxu2 %v1819_v8 }
 0x2a4   :  { %2746 = vst [vmem:[#allocation16_spill] sm:$0xff] %v2131_v57  ;;  %v147_v51 = vcvt.s32.f32 %v2131_v57  ;;  %v2188_v57 = vadd.s32 184, %v1880_v58 }
 0x2a6   :  { %v568_v27 = vpop.f32.mrf.mxu2  ;;  %2754 = vst [vmem:[#allocation20_spill] sm:$0xff] %v2188_v57 }
 0x2a7   :  { %v721_v6 = vmax.f32 %v568_v27, 0.0 }
 0x2a9   :  { %v785_v47 = vsel %vm657_vm8, %v721_v6, 0.0  ;;  %v179_v6 = vadd.f32 0.5, %v147_v51 }
 0x2aa   :  { %v876_v46 = vadd.f32 %v875_v13, %v785_v47  ;;  %v2136_v47 = vpop.f32.mrf.mxu1 }
 0x2ab   :  { %618 = vmatmul.f32.gmra.mxu2 %v2734_v17 }
 0x2ae   :  { %v571_v35 = vpop.f32.mrf.mxu2 }
 0x2af   :  { %v723_v7 = vmax.f32 %v571_v35, 0.0 }
 0x2b1   :  { %v787_v1 = vsel %vm659_vm9, %v723_v7, 0.0  ;;  %v211_v7 = vmul.f32 0.125, %v179_v6 }
 0x2b2   :  { %v877_v43 = vadd.f32 %v876_v46, %v787_v1 }
 0x2b3   :  { %621 = vmatmul.f32.gmra.mxu2 %v2736_v55 }
 0x2b6   :  { %v574_v21 = vpop.f32.mrf.mxu2 }
 0x2b7   :  { %v725_v8 = vmax.f32 %v574_v21, 0.0  ;;  %v243_v21 = vfloor.f32 %v211_v7 }
 0x2b9   :  { %v789_v19 = vsel %vm661_vm10, %v725_v8, 0.0 }
 0x2ba   :  { %v878_v41 = vadd.f32 %v877_v43, %v789_v19  ;;  %v2140_v19 = vpop.f32.mrf.mxu1 }
 0x2bb   :  { %624 = vmatmul.f32.gmra.mxu2 %v2745_v40  ;;  %v2142_v40 = vcvt.f32.s32 %v243_v21 }
 0x2bd   :  { %2747 = vst [vmem:[#allocation15_spill] sm:$0xff] %v2142_v40  ;;  %vm673_vm0 = vcmp.eq.s32.totalorder %v2142_v40, %v2083_v9  ;;  %vm672_vm1 = vcmp.eq.s32.totalorder %v2142_v40, %v1930_v25 }
 0x2be   :  { %v577_v17 = vpop.f32.mrf.mxu2 }
 0x2bf   :  { %v727_v2 = vmax.f32 %v577_v17, 0.0 }
 0x2c1   :  { %v791_v30 = vsel %vm663_vm11, %v727_v2, 0.0 }
 0x2c2   :  { %v879_v23 = vadd.f32 %v878_v41, %v791_v30 }
 0x2c6   :  { %v580_v55 = vpop.f32.mrf.mxu2 }
 0x2c7   :  { %v729_v3 = vmax.f32 %v580_v55, 0.0  ;;  %v2148_v55 = vpop.f32.mrf.mxu1 }
 0x2c9   :  { %v793_v42 = vsel %vm665_vm12, %v729_v3, 0.0 }
 0x2ca   :  { %v880_v62 = vadd.f32 %v879_v23, %v793_v42  ;;  %v2152_v42 = vpop.f32.mrf.mxu3 }
 0x2ce   :  { %v583_v4 = vpop.f32.mrf.mxu2 }
 0x2cf   :  { %v731_v50 = vmax.f32 %v583_v4, 0.0 }
 0x2d1   :  { %v795_v44 = vsel %vm667_vm13, %v731_v50, 0.0  ;;  %v2159_v50 = vadd.s32 136, %v1880_v58 }
 0x2d2   :  { %v881_v5 = vadd.f32 %v880_v62, %v795_v44  ;;  %v2154_v62 = vpop.f32.mrf.mxu1  ;;  %v2162_v44 = vadd.s32 144, %v1880_v58 }
 0x2d3   :  { %2748 = vst [vmem:[#allocation14_spill] sm:$0xff] %v2159_v50  ;;  %v148_v51 = vcvt.s32.f32 %v2159_v50 }
 0x2d4   :  { %2749 = vst [vmem:[#allocation25_spill] sm:$0xff] %v2162_v44  ;;  %v149_v6 = vcvt.s32.f32 %v2162_v44 }
 0x2d5   :  { %v180_v7 = vadd.f32 0.5, %v148_v51 }
 0x2d6   :  { %v586_v13 = vpop.f32.mrf.mxu2 }
 0x2d7   :  { %v733_v27 = vmax.f32 %v586_v13, 0.0  ;;  %v2169_v13 = vadd.s32 160, %v1880_v58 }
 0x2d9   :  { %v797_v46 = vsel %vm669_vm14, %v733_v27, 0.0  ;;  %2751 = vst [vmem:[#allocation26_spill] sm:$0xff] %v2169_v13  ;;  %v2171_v27 = vpop.f32.mrf.mxu3  ;;  %v151_v21 = vcvt.s32.f32 %v2169_v13 }
 0x2da   :  { %v882_v35 = vadd.f32 %v881_v5, %v797_v46  ;;  %v2165_v5 = vadd.s32 152, %v1880_v58 }
 0x2db   :  { %v183_v50 = vadd.f32 0.5, %v151_v21 }
 0x2dc   :  { %2750 = vst [vmem:[#allocation17_spill] sm:$0xff] %v2165_v5 }
 0x2dd   :  { %v215_v54 = vmul.f32 0.125, %v183_v50  ;;  %v736_v50 = vmax.f32 %v2117_v39, 0.0 }
 0x2de   :  { %v589_v1 = vpop.f32.mrf.mxu2 }
 0x2df   :  { %v735_v43 = vmax.f32 %v589_v1, 0.0  ;;  %v2178_v1 = vadd.s32 168, %v1880_v58  ;;  %v800_v39 = vsel %vm672_vm1, %v736_v50, 0.0 }
 0x2e1   :  { %v799_v8 = vsel %vm671_vm15, %v735_v43, 0.0  ;;  %2752 = vst [vmem:[#allocation18_spill] sm:$0xff] %v2178_v1  ;;  %v2180_v43 = vpop.f32.mrf.mxu1  ;;  %v2196_v13 = vpop.f32.mrf.mxu3 }
 0x2e2   :  { %v883_v41 = vadd.f32 %v882_v35, %v799_v8  ;;  %v150_v35 = vcvt.s32.f32 %v2165_v5  ;;  %v181_v8 = vadd.f32 0.5, %v149_v6  ;;  %v2192_v5 = vadd.s32 192, %v1880_v58 }
 0x2e4   :  { %v213_v51 = vmul.f32 0.125, %v181_v8  ;;  %2755 = vst [vmem:[#allocation21_spill] sm:$0xff] %v2192_v5 }
 0x2e6   :  { %v592_v17 = vpop.f32.mrf.mxu2  ;;  %v245_v21 = vfloor.f32 %v213_v51 }
 0x2e7   :  { %v737_v2 = vmax.f32 %v592_v17, 0.0  ;;  %v182_v17 = vadd.f32 0.5, %v150_v35 }
 0x2e8   :  { %v2217_v51 = vcvt.f32.s32 %v245_v21  ;;  %v740_v21 = vmax.f32 %v2126_v59, 0.0  ;;  %v847_v59 = vadd.f32 %v2080_v12, %v800_v39  ;;  %v746_v39 = vmax.f32 %v2148_v55, 0.0 }
 0x2e9   :  { %v801_v30 = vsel %vm673_vm0, %v737_v2, 0.0  ;;  %v212_v2 = vmul.f32 0.125, %v180_v7  ;;  %v214_v6 = vmul.f32 0.125, %v182_v17  ;;  %v154_v7 = vcvt.s32.f32 %v2188_v57  ;;  %v2203_v36 = vpop.f32.mrf.mxu1 }
 0x2ea   :  { %v2146_v23 = vadd.f32 %v883_v41, %v801_v30  ;;  %v2184_v41 = vadd.s32 176, %v1880_v58  ;;  %v152_v30 = vcvt.s32.f32 %v2178_v1  ;;  %v2200_v1 = vadd.s32 200, %v1880_v58 }
 0x2eb   :  { %v244_v33 = vfloor.f32 %v212_v2  ;;  %v246_v17 = vfloor.f32 %v214_v6  ;;  %vm676_vm3 = vcmp.eq.s32.totalorder %v2217_v51, %v1930_v25  ;;  %vm677_vm14 = vcmp.eq.s32.totalorder %v2217_v51, %v2083_v9 }
 0x2ec   :  { %2753 = vst [vmem:[#allocation19_spill] sm:$0xff] %v2184_v41  ;;  %v153_v44 = vcvt.s32.f32 %v2184_v41  ;;  %v184_v35 = vadd.f32 0.5, %v152_v30  ;;  %v155_v41 = vcvt.s32.f32 %v2192_v5  ;;  %v186_v30 = vadd.f32 0.5, %v154_v7 }
 0x2ed   :  { %2756 = vst [vmem:[#allocation22_spill] sm:$0xff] %v2200_v1  ;;  %v2208_v11 = vcvt.f32.s32 %v244_v33  ;;  %v156_v57 = vcvt.s32.f32 %v2200_v1  ;;  %v157_v33 = vcvt.s32.f32 %v2206_v31  ;;  %v2223_v7 = vcvt.f32.s32 %v246_v17 }
 0x2ee   :  { %v2150_v3 = vpop.f32.mrf.mxu2  ;;  %v185_v8 = vadd.f32 0.5, %v153_v44  ;;  %v216_v2 = vmul.f32 0.125, %v184_v35  ;;  %v247_v44 = vfloor.f32 %v215_v54  ;;  %v187_v29 = vadd.f32 0.5, %v155_v41 }
 0x2ef   :  { %v738_v35 = vmax.f32 %v2122_v63, 0.0  ;;  %vm674_vm2 = vcmp.eq.s32.totalorder %v2208_v11, %v1930_v25  ;;  %v218_v40 = vmul.f32 0.125, %v186_v30  ;;  %v188_v60 = vadd.f32 0.5, %v156_v57 }
 0x2f0   :  { %v217_v5 = vmul.f32 0.125, %v185_v8  ;;  %v248_v1 = vfloor.f32 %v216_v2  ;;  %v158_v54 = vcvt.s32.f32 %v2212_v14  ;;  %v2229_v41 = vcvt.f32.s32 %v247_v44  ;;  %v2231_v8 = vpop.f32.mrf.mxu3 }
 0x2f1   :  { %v219_v17 = vmul.f32 0.125, %v187_v29  ;;  %v189_v31 = vadd.f32 0.5, %v157_v33  ;;  %v802_v2 = vsel %vm674_vm2, %v738_v35, 0.0  ;;  %vm678_vm4 = vcmp.eq.s32.totalorder %v2223_v7, %v1930_v25  ;;  %v506_v14 = vpop.f32.mrf.mxu1 }
 0x2f2   :  { %v249_v63 = vfloor.f32 %v217_v5  ;;  %v742_v57 = vmax.f32 %v2136_v47, 0.0  ;;  %v2242_v30 = vcvt.f32.s32 %v248_v1  ;;  %v250_v50 = vfloor.f32 %v218_v40 }
 0x2f3   :  { %v220_v44 = vmul.f32 0.125, %v188_v60  ;;  %v2245_v5 = vadd.s32 232, %v1880_v58  ;;  %v804_v29 = vsel %vm676_vm3, %v740_v21, 0.0  ;;  %vm680_vm5 = vcmp.eq.s32.totalorder %v2229_v41, %v1930_v25 }
 0x2f4   :  { %v744_v33 = vmax.f32 %v2140_v19, 0.0  ;;  %v848_v35 = vadd.f32 %v847_v59, %v802_v2  ;;  %v2250_v15 = vcvt.f32.s32 %v249_v63  ;;  %v251_v47 = vfloor.f32 %v219_v17 }
 0x2f5   :  { %2760 = vst [vmem:[#allocation27_spill] sm:$0xff] %v2245_v5  ;;  %v221_v61 = vmul.f32 0.125, %v189_v31  ;;  %v190_v1 = vadd.f32 0.5, %v158_v54  ;;  %v159_v60 = vcvt.s32.f32 %v2236_v18  ;;  %v806_v40 = vsel %vm678_vm4, %v742_v57, 0.0 }
 0x2f6   :  { %v2156_v4 = vpop.f32.mrf.mxu2  ;;  %v849_v21 = vadd.f32 %v848_v35, %v804_v29  ;;  %vm682_vm6 = vcmp.eq.s32.totalorder %v2242_v30, %v1930_v25  ;;  %v2261_v19 = vcvt.f32.s32 %v250_v50  ;;  %v252_v63 = vfloor.f32 %v220_v44 }
 0x2f7   :  { %v160_v31 = vcvt.s32.f32 %v2245_v5  ;;  %v2265_v17 = vadd.s32 240, %v1880_v58  ;;  %v808_v54 = vsel %vm680_vm5, %v744_v33, 0.0  ;;  %v748_v2 = vmax.f32 %v2154_v62, 0.0 }
 0x2f8   :  { %v850_v57 = vadd.f32 %v849_v21, %v806_v40  ;;  %vm684_vm7 = vcmp.eq.s32.totalorder %v2250_v15, %v1930_v25  ;;  %v2273_v55 = vcvt.f32.s32 %v251_v47  ;;  %v253_v59 = vfloor.f32 %v221_v61  ;;  %v2276_v18 = vpop.f32.mrf.mxu3 }
 0x2f9   :  { %2761 = vst [vmem:[#allocation47_spill] sm:$0xff] %v2265_v17  ;;  %v222_v50 = vmul.f32 0.125, %v190_v1  ;;  %v810_v44 = vsel %vm682_vm6, %v746_v39, 0.0  ;;  %v750_v29 = vmax.f32 %v2180_v43, 0.0  ;;  %v191_v35 = vadd.f32 0.5, %v159_v60  ;;  %v509_v1 = vpop.f32.mrf.mxu1 }
 0x2fa   :  { %v851_v5 = vadd.f32 %v850_v57, %v808_v54  ;;  %vm686_vm8 = vcmp.eq.s32.totalorder %v2261_v19, %v1930_v25  ;;  %v2280_v33 = vcvt.f32.s32 %v252_v63  ;;  %v192_v62 = vadd.f32 0.5, %v160_v31 }
 0x2fb   :  { %v812_v40 = vsel %vm684_vm7, %v748_v2, 0.0  ;;  %v752_v21 = vmax.f32 %v2203_v36, 0.0  ;;  %v161_v47 = vcvt.s32.f32 %v2265_v17  ;;  %vm688_vm9 = vcmp.eq.s32.totalorder %v2273_v55, %v1930_v25 }
 0x2fc   :  { %v852_v61 = vadd.f32 %v851_v5, %v810_v44  ;;  %v2286_v43 = vcvt.f32.s32 %v253_v59  ;;  %v254_v39 = vfloor.f32 %v222_v50  ;;  %v814_v54 = vsel %vm686_vm8, %v750_v29, 0.0 }
 0x2fd   :  { %v754_v57 = vmax.f32 %v506_v14, 0.0  ;;  %v223_v63 = vmul.f32 0.125, %v191_v35  ;;  %v2291_v31 = vadd.s32 248, %v1880_v58  ;;  %vm690_vm10 = vcmp.eq.s32.totalorder %v2280_v33, %v1930_v25 }
 0x2fe   :  { %v2174_v46 = vpop.f32.mrf.mxu2  ;;  %v853_v2 = vadd.f32 %v852_v61, %v812_v40  ;;  %v816_v36 = vsel %vm688_vm9, %v752_v21, 0.0  ;;  %v756_v5 = vmax.f32 %v509_v1, 0.0  ;;  %v224_v44 = vmul.f32 0.125, %v192_v62 }
 0x2ff   :  { %v193_v17 = vadd.f32 0.5, %v161_v47  ;;  %vm692_vm11 = vcmp.eq.s32.totalorder %v2286_v43, %v1930_v25  ;;  %v2297_v24 = vcvt.f32.s32 %v254_v39  ;;  %v818_v50 = vsel %vm690_vm10, %v754_v57, 0.0 }
 0x300   :  { %v854_v59 = vadd.f32 %v853_v2, %v814_v54  ;;  %v255_v14 = vfloor.f32 %v223_v63  ;;  %v162_v29 = vcvt.s32.f32 %v2291_v31  ;;  %v2300_v35 = vpop.f32.mrf.mxu3  ;;  %v820_v61 = vsel %vm692_vm11, %v756_v5, 0.0 }
 0x301   :  { %v256_v56 = vfloor.f32 %v224_v44  ;;  %v225_v38 = vmul.f32 0.125, %v193_v17  ;;  %vm694_vm12 = vcmp.eq.s32.totalorder %v2297_v24, %v1930_v25  ;;  %v758_v62 = vmax.f32 %v2152_v42, 0.0 }
 0x302   :  { %v855_v40 = vadd.f32 %v854_v59, %v816_v36  ;;  %v739_v47 = vmax.f32 %v2150_v3, 0.0  ;;  %v2308_v39 = vcvt.f32.s32 %v255_v14  ;;  %v194_v54 = vadd.f32 0.5, %v162_v29 }
 0x303   :  { %vm675_vm13 = vcmp.eq.s32.totalorder %v2208_v11, %v2083_v9  ;;  %v741_v63 = vmax.f32 %v2156_v4, 0.0  ;;  %v2313_v17 = vcvt.f32.s32 %v256_v56  ;;  %v257_v2 = vfloor.f32 %v225_v38 }
 0x304   :  { %v856_v21 = vadd.f32 %v855_v40, %v818_v50  ;;  %v822_v36 = vsel %vm694_vm12, %v758_v62, 0.0  ;;  %v760_v42 = vmax.f32 %v2171_v27, 0.0  ;;  %v803_v5 = vsel %vm675_vm13, %v739_v47, 0.0 }
 0x305   :  { %v743_v3 = vmax.f32 %v2174_v46, 0.0  ;;  %vm696_vm15 = vcmp.eq.s32.totalorder %v2308_v39, %v1930_v25  ;;  %v226_v44 = vmul.f32 0.125, %v194_v54  ;;  %vm679_vm0 = vcmp.eq.s32.totalorder %v2223_v7, %v2083_v9 }
 0x306   :  { %v2194_v52 = vpop.f32.mrf.mxu2  ;;  %v857_v57 = vadd.f32 %v856_v21, %v820_v61  ;;  %v805_v56 = vsel %vm677_vm14, %v741_v63, 0.0  ;;  %vm698_vm1 = vcmp.eq.s32.totalorder %v2313_v17, %v1930_v25  ;;  %v2326_v4 = vcvt.f32.s32 %v257_v2 }
 0x307   :  { %v745_v38 = vmax.f32 %v2194_v52, 0.0  ;;  %v885_v46 = vadd.f32 %v2146_v23, %v803_v5  ;;  %vm681_vm2 = vcmp.eq.s32.totalorder %v2229_v41, %v2083_v9  ;;  %v824_v14 = vsel %vm696_vm15, %v760_v42, 0.0 }
 0x308   :  { %v858_v59 = vadd.f32 %v857_v57, %v822_v36  ;;  %v2328_v27 = vpop.f32.mrf.mxu3  ;;  %v762_v29 = vmax.f32 %v2196_v13, 0.0  ;;  %v807_v40 = vsel %vm679_vm0, %v743_v3, 0.0  ;;  %v258_v52 = vfloor.f32 %v226_v44 }
 0x309   :  { %v886_v62 = vadd.f32 %v885_v46, %v805_v56  ;;  %vm683_vm3 = vcmp.eq.s32.totalorder %v2242_v30, %v2083_v9  ;;  %v809_v47 = vsel %vm681_vm2, %v745_v38, 0.0  ;;  %vm700_vm4 = vcmp.eq.s32.totalorder %v2326_v4, %v1930_v25 }
 0x30a   :  { %v859_v21 = vadd.f32 %v858_v59, %v824_v14  ;;  %vm685_vm5 = vcmp.eq.s32.totalorder %v2250_v15, %v2083_v9  ;;  %v826_v13 = vsel %vm698_vm1, %v762_v29, 0.0  ;;  %v2347_v2 = vcvt.f32.s32 %v258_v52 }
 0x30b   :  { %v887_v23 = vadd.f32 %v886_v62, %v807_v40  ;;  %vm687_vm6 = vcmp.eq.s32.totalorder %v2261_v19, %v2083_v9  ;;  %vm689_vm7 = vcmp.eq.s32.totalorder %v2273_v55, %v2083_v9  ;;  %vm691_vm9 = vcmp.eq.s32.totalorder %v2280_v33, %v2083_v9 }
 0x30c   :  { %v860_v36 = vadd.f32 %v859_v21, %v826_v13  ;;  %vm702_vm8 = vcmp.eq.s32.totalorder %v2347_v2, %v1930_v25  ;;  %vm693_vm10 = vcmp.eq.s32.totalorder %v2286_v43, %v2083_v9  ;;  %vm695_vm11 = vcmp.eq.s32.totalorder %v2297_v24, %v2083_v9 }
 0x30d   :  { %vm697_vm12 = vcmp.eq.s32.totalorder %v2308_v39, %v2083_v9  ;;  %vm699_vm13 = vcmp.eq.s32.totalorder %v2313_v17, %v2083_v9  ;;  %vm701_vm14 = vcmp.eq.s32.totalorder %v2326_v4, %v2083_v9  ;;  %vm703_vm15 = vcmp.eq.s32.totalorder %v2347_v2, %v2083_v9 }
 0x30e   :  { %v2220_v6 = vpop.f32.mrf.mxu2  ;;  %vm906_vm2 = vcmp.eq.s32.totalorder %v1880_v58, %v1930_v25 }
 0x30f   :  { %v747_v61 = vmax.f32 %v2220_v6, 0.0  ;;  %v764_v6 = vmax.f32 %v2231_v8, 0.0 }
 0x310   :  { %v634_v38 = vpop.f32.mrf.mxu3 }
 0x311   :  { %v811_v57 = vsel %vm683_vm3, %v747_v61, 0.0  ;;  %v828_v8 = vsel %vm700_vm4, %v764_v6, 0.0  ;;  %vm907_vm3 = vcmp.eq.s32.totalorder %v1880_v58, %v2083_v9 }
 0x312   :  { %v861_v46 = vadd.f32 %v860_v36, %v828_v8 }
 0x316   :  { %v2252_v12 = vpop.f32.mrf.mxu2 }
 0x317   :  { %v749_v54 = vmax.f32 %v2252_v12, 0.0  ;;  %v888_v12 = vadd.f32 %v887_v23, %v809_v47 }
 0x318   :  { %v637_v36 = vpop.f32.mrf.mxu3 }
 0x319   :  { %v813_v42 = vsel %vm685_vm5, %v749_v54, 0.0  ;;  %v889_v3 = vadd.f32 %v888_v12, %v811_v57  ;;  %v761_v54 = vmax.f32 %v2300_v35, 0.0  ;;  %v763_v57 = vmax.f32 %v2328_v27, 0.0 }
 0x31a   :  { %v767_v8 = vmax.f32 %v637_v36, 0.0  ;;  %v2764_v36 = vld [vmem:[#allocation28_spill] sm:$0xff] }
 0x31b   :  { %v890_v14 = vadd.f32 %v889_v3, %v813_v42  ;;  %v825_v42 = vsel %vm697_vm12, %v761_v54, 0.0  ;;  %vm909_vm5 = vcmp.eq.s32.totalorder %v2764_v36, %v2083_v9 }
 0x31e   :  { %v2288_v60 = vpop.f32.mrf.mxu2 }
 0x31f   :  { %v751_v63 = vmax.f32 %v2288_v60, 0.0  ;;  %v766_v60 = vmax.f32 %v2276_v18, 0.0 }
 0x321   :  { %v815_v59 = vsel %vm687_vm6, %v751_v63, 0.0  ;;  %v830_v61 = vsel %vm702_vm8, %v766_v60, 0.0 }
 0x322   :  { %v891_v40 = vadd.f32 %v890_v14, %v815_v59  ;;  %v862_v18 = vadd.f32 %v861_v46, %v830_v61  ;;  %v831_v46 = vsel %vm703_vm15, %v767_v8, 0.0 }
 0x324   :  { %v863_v13 = vrot.slane %v862_v18, 4 }
 0x326   :  { %v2302_v1 = vpop.f32.mrf.mxu2  ;;  %v864_v3 = vadd.f32 %v863_v13, %v862_v18  ;;  %v2762_v18 = vld [vmem:[#allocation30_spill] sm:$0xff] }
 0x327   :  { %v753_v5 = vmax.f32 %v2302_v1, 0.0  ;;  %vm910_vm0 = vcmp.eq.s32.totalorder %v2762_v18, %v1930_v25  ;;  %vm911_vm1 = vcmp.eq.s32.totalorder %v2762_v18, %v2083_v9 }
 0x329   :  { %v817_v1 = vsel %vm689_vm7, %v753_v5, 0.0  ;;  %v765_v5 = vmax.f32 %v634_v38, 0.0  ;;  %vm908_vm7 = vcmp.eq.s32.totalorder %v2764_v36, %v1930_v25 }
 0x32a   :  { %v892_v21 = vadd.f32 %v891_v40, %v817_v1 }
 0x32b   :  { %v829_v27 = vsel %vm701_vm14, %v765_v5, 0.0 }
 0x32e   :  { %v619_v50 = vpop.f32.mrf.mxu2 }
 0x32f   :  { %v755_v56 = vmax.f32 %v619_v50, 0.0 }
 0x331   :  { %v819_v52 = vsel %vm691_vm9, %v755_v56, 0.0  ;;  %v865_v56 = vrot.slane %v864_v3, 2 }
 0x332   :  { %v893_v62 = vadd.f32 %v892_v21, %v819_v52 }
 0x336   :  { %v622_v44 = vpop.f32.mrf.mxu2 }
 0x337   :  { %v757_v29 = vmax.f32 %v622_v44, 0.0  ;;  %v827_v44 = vsel %vm699_vm13, %v763_v57, 0.0 }
 0x339   :  { %v821_v50 = vsel %vm693_vm10, %v757_v29, 0.0  ;;  %v866_v29 = vadd.f32 %v865_v56, %v864_v3 }
 0x33a   :  { %v894_v6 = vadd.f32 %v893_v62, %v821_v50 }
 0x33b   :  { %v867_v38 = vrot.slane %v866_v29, 1 }
 0x33d   :  { %v868_v21 = vadd.f32 %v867_v38, %v866_v29 }
 0x33e   :  { %v625_v47 = vpop.f32.mrf.mxu2 }
 0x33f   :  { %v759_v23 = vmax.f32 %v625_v47, 0.0  ;;  %v2384_v47 = vsel %vm910_vm0, %v868_v21, 0.0 }
 0x341   :  { %v823_v63 = vsel %vm695_vm11, %v759_v23, 0.0  ;;  %v914_v23 = vsel %vm906_vm2, %v868_v21, 0.0 }
 0x342   :  { %v895_v12 = vadd.f32 %v894_v6, %v823_v63  ;;  %v2763_v63 = vld [vmem:[#allocation31_spill] sm:$0xff] }
 0x343   :  { %vm913_vm4 = vcmp.eq.s32.totalorder %v2763_v63, %v2083_v9  ;;  %vm912_vm6 = vcmp.eq.s32.totalorder %v2763_v63, %v1930_v25 }
 0x344   :  { %v896_v35 = vadd.f32 %v895_v12, %v825_v42  ;;  %v2405_v5 = vsel %vm912_vm6, %v868_v21, 0.0 }
 0x346   :  { %v897_v60 = vadd.f32 %v896_v35, %v827_v44  ;;  %v2407_v35 = vsel %vm908_vm7, %v868_v21, 0.0 }
 0x348   :  { %v898_v59 = vadd.f32 %v897_v60, %v829_v27 }
 0x34a   :  { %v899_v14 = vadd.f32 %v898_v59, %v831_v46 }
 0x34c   :  { %v900_v1 = vrot.slane %v899_v14, 4 }
 0x34e   :  { %v901_v40 = vadd.f32 %v900_v1, %v899_v14 }
 0x350   :  { %v902_v61 = vrot.slane %v901_v40, 2 }
 0x352   :  { %v903_v52 = vadd.f32 %v902_v61, %v901_v40 }
 0x354   :  { %v904_v50 = vrot.slane %v903_v52, 1 }
 0x356   :  { %v905_v62 = vadd.f32 %v904_v50, %v903_v52 }
 0x358   :  { %v2386_v54 = vsel %vm911_vm1, %v905_v62, 0.0  ;;  %v2388_v13 = vsel %vm907_vm3, %v905_v62, 0.0  ;;  %v2401_v12 = vsel %vm913_vm4, %v905_v62, 0.0  ;;  %v2403_v42 = vsel %vm909_vm5, %v905_v62, 0.0 }
 0x359   :  { %v928_v6 = vadd.f32 %v2386_v54, %v2384_v47  ;;  %v922_v57 = vadd.f32 %v2388_v13, %v914_v23  ;;  %v931_v3 = vadd.f32 %v2401_v12, %v2405_v5  ;;  %v925_v9 = vadd.f32 %v2403_v42, %v2407_v35 }
 0x35b   :  { %929 = vadd.xlane.f32.xlu1 %v928_v6  ;;  %923 = vadd.xlane.f32.xlu0 %v922_v57 }
 0x363   :  { %932 = vadd.xlane.f32.xlu1 %v931_v3  ;;  %926 = vadd.xlane.f32.xlu0 %v925_v9  ;;  %v1075_v9 = vmul.u32 8, %v2074_v0  ;;  %v1073_v0 = vmul.u32 8, %v2063_v16 }
 0x3ce   :  { %v2413_v44 = vpop.xlane.xlu1 %929  ;;  %v924_v8 = vpop.xlane.xlu0 %923 }
 0x3cf   :  { %1491 = vrcp.f32 %v2413_v44  ;;  %v945_v1 = vand.u32 2147483648, %v924_v8  ;;  %v943_v40 = vand.u32 2147483647, %v924_v8  ;;  %vm939_vm9 = vweird.f32 %v924_v8 }
 0x3d0   :  { %1493 = vrcp.f32 %v924_v8  ;;  %vm967_vm4 = vweird.f32 %v2413_v44 }
 0x3d1   :  { %v946_v21 = vor.u32 1.1754944e-38, %v945_v1  ;;  %vm944_vm11 = vcmp.eq.f32.partialorder %v943_v40, 8.507059e+37 }
 0x3d5   :  { %v2416_v25 = vpop.eup %1491 }
 0x3d6   :  { %v1494_v60 = vpop.eup %1493  ;;  %v2418_v27 = vpop.xlane.xlu1 %932  ;;  %v963_v46 = vmul.f32 %v2416_v25, %v2413_v44  ;;  %vm968_vm1 = vweird.f32 %v2416_v25 }
 0x3d7   :  { %v927_v59 = vpop.xlane.xlu0 %926  ;;  %v935_v56 = vmul.f32 %v1494_v60, %v924_v8  ;;  %vm940_vm8 = vweird.f32 %v1494_v60  ;;  %vm2464_vm6 = vmor %vm967_vm4, %vm968_vm1 }
 0x3d8   :  { %1495 = vrcp.f32 %v927_v59  ;;  %v964_v38 = vsub.f32 1.0, %v963_v46  ;;  %vm941_vm10 = vmor %vm939_vm9, %vm940_vm8  ;;  %v959_v57 = vand.u32 2147483648, %v927_v59  ;;  %v957_v8 = vand.u32 2147483647, %v927_v59 }
 0x3d9   :  { %v936_v14 = vsub.f32 1.0, %v935_v56  ;;  %1497 = vrcp.f32 %v2418_v27  ;;  %vm953_vm14 = vweird.f32 %v927_v59 }
 0x3da   :  { %v965_v56 = vmul.f32 %v2416_v25, %v964_v38  ;;  %v1072_v38 = vmul.u32 8, %v2054_v20  ;;  %vm958_vm0 = vcmp.eq.f32.partialorder %v957_v8, 8.507059e+37 }
 0x3db   :  { %v937_v29 = vmul.f32 %v1494_v60, %v936_v14 }
 0x3dd   :  { %v938_v61 = vadd.f32 %v1494_v60, %v937_v29  ;;  %v1107_v29 = vsub.s32 %v2060_v48, %v1075_v9  ;;  %v1105_v48 = vsub.s32 %v2041_v28, %v1073_v0  ;;  %v1071_v28 = vmul.u32 8, %v2045_v34 }
 0x3de   :  { %v1496_v52 = vpop.eup %1495  ;;  %v1070_v9 = vmul.u32 8, %v2035_v22  ;;  %v2768_v22 = vld [vmem:[#allocation44_spill] sm:$0xff] }
 0x3df   :  { %v2423_v50 = vpop.eup %1497  ;;  %v949_v62 = vmul.f32 %v1496_v52, %v927_v59  ;;  %v942_v6 = vsel %vm941_vm10, %v1494_v60, %v938_v61  ;;  %vm954_vm12 = vweird.f32 %v1496_v52  ;;  %v1074_v60 = vmul.u32 8, %v2069_v32 }
 0x3e0   :  { %v2425_v3 = vsel %vm944_vm11, %v946_v21, %v942_v6  ;;  %v977_v1 = vmul.f32 %v2423_v50, %v2418_v27  ;;  %vm1139_vm13 = vcmp.eq.s32.totalorder %v1107_v29, %v2742_v37  ;;  %v1607_v21 = vmov 1.0   ;;  %vm955_vm15 = vmor %vm953_vm14, %vm954_vm12 }
 0x3e1   :  { %v950_v14 = vsub.f32 1.0, %v949_v62  ;;  %v2430_v46 = vmul.f32 %v2425_v3, %v914_v23  ;;  %v1106_v23 = vsub.s32 %v2051_v49, %v1074_v60  ;;  %v1104_v32 = vsub.s32 %v2030_v10, %v1072_v38  ;;  %v2769_v60 = vld [vmem:[#allocation42_spill] sm:$0xff] }
 0x3e2   :  { %v960_v62 = vor.u32 1.1754944e-38, %v959_v57  ;;  %v978_v20 = vsub.f32 1.0, %v977_v1  ;;  %v966_v49 = vadd.f32 %v2416_v25, %v965_v56  ;;  %vm1137_vm3 = vcmp.eq.s32.totalorder %v1105_v48, %v2742_v37  ;;  %v2777_v57 = vld [vmem:[#allocation38_spill] sm:$0xff] }
 0x3e3   :  { %v951_v40 = vmul.f32 %v1496_v52, %v950_v14  ;;  %1014 = vmatmul.f32.vlgmr.msra.gmra.mxu3 %v2430_v46  ;;  %vm1138_vm2 = vcmp.eq.s32.totalorder %v1106_v23, %v2742_v37  ;;  %v973_v10 = vand.u32 2147483648, %v2413_v44  ;;  %vm1136_vm5 = vcmp.eq.s32.totalorder %v1104_v32, %v2742_v37  ;;  %v2773_v32 = vld [vmem:[#allocation40_spill] sm:$0xff] }
 0x3e4   :  { %1352 = vmatpush.msk.msra.mxu3 %vm1139_vm13, %v1607_v21  ;;  %v1103_v34 = vsub.s32 %v2016_v26, %v1071_v28  ;;  %v1069_v56 = vmul.u32 8, %v2022_v45  ;;  %v1068_v14 = vmul.u32 8, %v2008_v53  ;;  %v2767_v26 = vld [vmem:[#allocation46_spill] sm:$0xff]  ;;  %vm982_vm10 = vweird.f32 %v2423_v50 }
 0x3e5   :  { %v952_v61 = vadd.f32 %v1496_v52, %v951_v40  ;;  %v974_v8 = vor.u32 1.1754944e-38, %v973_v10  ;;  %v1102_v1 = vsub.s32 %v2767_v26, %v1070_v9  ;;  %v987_v45 = vand.u32 2147483648, %v2418_v27  ;;  %v2776_v10 = vld [vmem:[#allocation39_spill] sm:$0xff]  ;;  %v2778_v9 = vld [vmem:[#allocation33_spill] sm:$0xff] }
 0x3e6   :  { %1353 = vmatpush.msk.msra.mxu3 %vm1138_vm2, %v1607_v21  ;;  %vm1135_vm7 = vcmp.eq.s32.totalorder %v1103_v34, %v2742_v37  ;;  %v1101_v29 = vsub.s32 %v2768_v22, %v1069_v56  ;;  %v1100_v40 = vsub.s32 %v2769_v60, %v1068_v14  ;;  %vm981_vm12 = vweird.f32 %v2418_v27  ;;  %v2781_v22 = vld [vmem:[#allocation36_spill] sm:$0xff]  ;;  %v2782_v60 = vld [vmem:[#allocation34_spill] sm:$0xff] }
 0x3e7   :  { %v956_v16 = vsel %vm955_vm15, %v1496_v52, %v952_v61  ;;  %v971_v52 = vand.u32 2147483647, %v2413_v44  ;;  %v970_v44 = vsel %vm2464_vm6, %v2416_v25, %v966_v49  ;;  %vm1134_vm9 = vcmp.eq.s32.totalorder %v1102_v1, %v2742_v37  ;;  %v2770_v25 = vld [vmem:[#allocation45_spill] sm:$0xff]  ;;  %vm2499_vm14 = vmor %vm981_vm12, %vm982_vm10 }
 0x3e8   :  { %v2450_v59 = vsel %vm958_vm0, %v960_v62, %v956_v16  ;;  %1354 = vmatpush.msk.msra.mxu3 %vm1137_vm3, %v1607_v21  ;;  %vm1133_vm11 = vcmp.eq.s32.totalorder %v1101_v29, %v2742_v37  ;;  %v1067_v38 = vmul.u32 8, %v2770_v25  ;;  %v985_v61 = vand.u32 2147483647, %v2418_v27  ;;  %v2775_v49 = vld [vmem:[#allocation41_spill] sm:$0xff] }
 0x3e9   :  { %v2456_v6 = vmul.f32 %v2450_v59, %v2407_v35  ;;  %v979_v35 = vmul.f32 %v2423_v50, %v978_v20  ;;  %vm972_vm8 = vcmp.eq.f32.partialorder %v971_v52, 8.507059e+37  ;;  %vm1132_vm13 = vcmp.eq.s32.totalorder %v1100_v40, %v2742_v37  ;;  %v2774_v20 = vld [vmem:[#allocation43_spill] sm:$0xff] }
 0x3ea   :  { %1355 = vmatpush.msk.msra.mxu3 %vm1136_vm5, %v1607_v21  ;;  %v2482_v0 = vsel %vm972_vm8, %v974_v8, %v970_v44  ;;  %v1099_v62 = vsub.s32 %v2773_v32, %v1067_v38  ;;  %v1066_v16 = vmul.u32 8, %v2774_v20  ;;  %v1065_v27 = vmul.u32 8, %v2775_v49  ;;  %v2779_v44 = vld [vmem:[#allocation32_spill] sm:$0xff] }
 0x3eb   :  { %1017 = vmatmul.f32.gmra.mxu3 %v2456_v6  ;;  %v980_v53 = vadd.f32 %v2423_v50, %v979_v35  ;;  %v2495_v23 = vmul.f32 %v2482_v0, %v2384_v47  ;;  %v1064_v28 = vmul.u32 8, %v2776_v10  ;;  %v988_v52 = vor.u32 1.1754944e-38, %v987_v45  ;;  %v2790_v10 = vld [vmem:[#allocation21_spill] sm:$0xff] }
 0x3ec   :  { %1356 = vmatpush.msk.msra.mxu3 %vm1135_vm7, %v1607_v21  ;;  %vm1131_vm15 = vcmp.eq.s32.totalorder %v1099_v62, %v2742_v37  ;;  %v1098_v34 = vsub.s32 %v2777_v57, %v1066_v16  ;;  %vm986_vm0 = vcmp.eq.f32.partialorder %v985_v61, 8.507059e+37  ;;  %v1097_v35 = vsub.s32 %v2778_v9, %v1065_v27  ;;  %v2786_v62 = vld [vmem:[#allocation24_spill] sm:$0xff] }
 0x3ed   :  { %v984_v47 = vsel %vm2499_vm14, %v2423_v50, %v980_v53  ;;  %v1096_v56 = vsub.s32 %v2779_v44, %v1064_v28  ;;  %v2780_v50 = vld [vmem:[#allocation37_spill] sm:$0xff]  ;;  %v1062_v29 = vmul.u32 8, %v2781_v22  ;;  %v1061_v40 = vmul.u32 8, %v2782_v60  ;;  %v2783_v53 = vld [vmem:[#allocation35_spill] sm:$0xff]  ;;  %v2794_v44 = vld [vmem:[#allocation26_spill] sm:$0xff] }
 0x3ee   :  { %1357 = vmatpush.msk.msra.mxu3 %vm1134_vm9, %v1607_v21  ;;  %v2517_v14 = vsel %vm986_vm0, %v988_v52, %v984_v47  ;;  %vm1130_vm1 = vcmp.eq.s32.totalorder %v1098_v34, %v2742_v37  ;;  %vm1129_vm2 = vcmp.eq.s32.totalorder %v1097_v35, %v2742_v37  ;;  %v1063_v8 = vmul.u32 8, %v2780_v50  ;;  %v2796_v22 = vld [vmem:[#allocation15_spill] sm:$0xff] }
 0x3ef   :  { %v2526_v26 = vmul.f32 %v2517_v14, %v2405_v5  ;;  %vm1128_vm3 = vcmp.eq.s32.totalorder %v1096_v56, %v2742_v37  ;;  %v1060_v45 = vmul.u32 8, %v2783_v53  ;;  %v1094_v5 = vsub.s32 %v2762_v18, %v1062_v29 }
 0x3f0   :  { %1358 = vmatpush.msk.msra.mxu3 %vm1133_vm11, %v1607_v21  ;;  %v1095_v1 = vsub.s32 %v2763_v63, %v1063_v8  ;;  %v1093_v25 = vsub.s32 %v2764_v36, %v1061_v40  ;;  %v1091_v63 = vmul.u32 8, %v2347_v2  ;;  %v2547_v61 = vmul.f32 %v2425_v3, %v2388_v13  ;;  %v2784_v2 = vld [vmem:[#allocation47_spill] sm:$0xff]  ;;  %v2799_v40 = vld [vmem:[#allocation16_spill] sm:$0xff] }
 0x3f1   :  { %v1092_v38 = vsub.s32 %v1880_v58, %v1060_v45  ;;  %vm1126_vm5 = vcmp.eq.s32.totalorder %v1094_v5, %v2742_v37  ;;  %v1090_v18 = vmul.u32 8, %v2326_v4  ;;  %v1089_v36 = vmul.u32 8, %v2313_v17  ;;  %v2785_v3 = vld [vmem:[#allocation27_spill] sm:$0xff] }
 0x3f2   :  { %1359 = vmatpush.msk.msra.mxu3 %vm1132_vm13, %v1607_v21  ;;  %vm1127_vm4 = vcmp.eq.s32.totalorder %v1095_v1, %v2742_v37  ;;  %vm1125_vm6 = vcmp.eq.s32.totalorder %v1093_v25, %v2742_v37  ;;  %v1123_v58 = vsub.s32 %v2291_v31, %v1091_v63  ;;  %v1088_v48 = vmul.u32 8, %v2308_v39  ;;  %v2787_v4 = vld [vmem:[#allocation23_spill] sm:$0xff] }
 0x3f3   :  { %1020 = vmatmul.f32.gmra.mxu3 %v2495_v23  ;;  %vm1124_vm7 = vcmp.eq.s32.totalorder %v1092_v38, %v2742_v37  ;;  %v1122_v13 = vsub.s32 %v2784_v2, %v1090_v18  ;;  %v1121_v32 = vsub.s32 %v2785_v3, %v1089_v36  ;;  %v1087_v39 = vmul.u32 8, %v2297_v24  ;;  %v2788_v24 = vld [vmem:[#allocation29_spill] sm:$0xff] }
 0x3f4   :  { %1360 = vmatpush.msk.msra.mxu3 %vm1131_vm15, %v1607_v21  ;;  %vm1155_vm8 = vcmp.eq.s32.totalorder %v1123_v58, %v2742_v37  ;;  %v1120_v31 = vsub.s32 %v2786_v62, %v1088_v48  ;;  %v993_v17 = vmul.f32 %v2450_v59, %v2403_v42  ;;  %v1086_v16 = vmul.u32 8, %v2286_v43  ;;  %v2789_v42 = vld [vmem:[#allocation22_spill] sm:$0xff]  ;;  %v2791_v43 = vld [vmem:[#allocation20_spill] sm:$0xff] }
 0x3f5   :  { %vm1154_vm9 = vcmp.eq.s32.totalorder %v1122_v13, %v2742_v37  ;;  %vm1153_vm10 = vcmp.eq.s32.totalorder %v1121_v32, %v2742_v37  ;;  %v1119_v20 = vsub.s32 %v2787_v4, %v1087_v39  ;;  %v1085_v47 = vmul.u32 8, %v2280_v33 }
 0x3f6   :  { %1361 = vmatpush.msk.msra.mxu3 %vm1130_vm1, %v1607_v21  ;;  %vm1152_vm11 = vcmp.eq.s32.totalorder %v1120_v31, %v2742_v37  ;;  %v1084_v49 = vmul.u32 8, %v2273_v55  ;;  %v1118_v27 = vsub.s32 %v2788_v24, %v1086_v16  ;;  %v1083_v55 = vmul.u32 8, %v2261_v19  ;;  %v2792_v19 = vld [vmem:[#allocation19_spill] sm:$0xff] }
 0x3f7   :  { %vm1151_vm12 = vcmp.eq.s32.totalorder %v1119_v20, %v2742_v37  ;;  %v1117_v59 = vsub.s32 %v2789_v42, %v1085_v47  ;;  %v995_v33 = vmul.f32 %v2482_v0, %v2386_v54  ;;  %v1082_v57 = vmul.u32 8, %v2250_v15  ;;  %v2793_v54 = vld [vmem:[#allocation18_spill] sm:$0xff] }
 0x3f8   :  { %1362 = vmatpush.msk.msra.mxu3 %vm1129_vm2, %v1607_v21  ;;  %v1116_v28 = vsub.s32 %v2790_v10, %v1084_v49  ;;  %vm1150_vm13 = vcmp.eq.s32.totalorder %v1118_v27, %v2742_v37  ;;  %v1115_v52 = vsub.s32 %v2791_v43, %v1083_v55  ;;  %v1081_v34 = vmul.u32 8, %v2242_v30  ;;  %v2795_v30 = vld [vmem:[#allocation17_spill] sm:$0xff] }
 0x3f9   :  { %vm1149_vm14 = vcmp.eq.s32.totalorder %v1117_v59, %v2742_v37  ;;  %v1080_v9 = vmul.u32 8, %v2229_v41  ;;  %v1114_v35 = vsub.s32 %v2792_v19, %v1082_v57  ;;  %v1079_v15 = vmul.u32 8, %v2223_v7  ;;  %v2797_v7 = vld [vmem:[#allocation25_spill] sm:$0xff] }
 0x3fa   :  { %1363 = vmatpush.msk.msra.mxu3 %vm1128_vm3, %v1607_v21  ;;  %vm1148_vm15 = vcmp.eq.s32.totalorder %v1116_v28, %v2742_v37  ;;  %vm1147_vm0 = vcmp.eq.s32.totalorder %v1115_v52, %v2742_v37  ;;  %v1113_v0 = vsub.s32 %v2793_v54, %v1081_v34  ;;  %v997_v41 = vmul.f32 %v2517_v14, %v2401_v12  ;;  %v2798_v12 = vld [vmem:[#allocation14_spill] sm:$0xff] }
 0x3fb   :  { %1023 = vmatmul.f32.gmra.mxu3 %v2526_v26  ;;  %v1112_v56 = vsub.s32 %v2794_v44, %v1080_v9  ;;  %vm1146_vm1 = vcmp.eq.s32.totalorder %v1114_v35, %v2742_v37  ;;  %v1111_v50 = vsub.s32 %v2795_v30, %v1079_v15  ;;  %v1078_v8 = vmul.u32 8, %v2217_v51 }
 0x3fc   :  { %1364 = vmatpush.msk.msra.mxu3 %vm1127_vm4, %v1607_v21  ;;  %vm1145_vm2 = vcmp.eq.s32.totalorder %v1113_v0, %v2742_v37  ;;  %v1077_v1 = vmul.u32 8, %v2208_v11  ;;  %v1076_v29 = vmul.u32 8, %v2796_v22 }
 0x3fd   :  { %vm1144_vm3 = vcmp.eq.s32.totalorder %v1112_v56, %v2742_v37  ;;  %vm1143_vm4 = vcmp.eq.s32.totalorder %v1111_v50, %v2742_v37  ;;  %v1110_v60 = vsub.s32 %v2797_v7, %v1078_v8 }
 0x3fe   :  { %1365 = vmatpush.msk.msra.mxu3 %vm1126_vm5, %v1607_v21  ;;  %v1109_v14 = vsub.s32 %v2798_v12, %v1077_v1  ;;  %v1108_v53 = vsub.s32 %v2799_v40, %v1076_v29 }
 0x3ff   :  { %vm1142_vm5 = vcmp.eq.s32.totalorder %v1110_v60, %v2742_v37 }
 0x400   :  { %1366 = vmatpush.msk.msra.mxu3 %vm1125_vm6, %v1607_v21  ;;  %vm1141_vm6 = vcmp.eq.s32.totalorder %v1109_v14, %v2742_v37 }
 0x402   :  { %1367 = vmatpush.msk.msra.mxu3 %vm1124_vm7, %v1607_v21  ;;  %vm1140_vm7 = vcmp.eq.s32.totalorder %v1108_v53, %v2742_v37 }
 0x403   :  { %1043 = vmatmul.f32.vlgmr.msrb.gmra.mxu3 %v2547_v61 }
 0x404   :  { %1368 = vmatpush.msk.msrb.mxu3 %vm1155_vm8, %v1607_v21 }
 0x406   :  { %1369 = vmatpush.msk.msrb.mxu3 %vm1154_vm9, %v1607_v21 }
 0x408   :  { %1370 = vmatpush.msk.msrb.mxu3 %vm1153_vm10, %v1607_v21 }
 0x40a   :  { %1371 = vmatpush.msk.msrb.mxu3 %vm1152_vm11, %v1607_v21 }
 0x40b   :  { %1046 = vmatmul.f32.gmra.mxu3 %v993_v17 }
 0x40c   :  { %1372 = vmatpush.msk.msrb.mxu3 %vm1151_vm12, %v1607_v21 }
 0x40e   :  { %1373 = vmatpush.msk.msrb.mxu3 %vm1150_vm13, %v1607_v21 }
 0x410   :  { %1374 = vmatpush.msk.msrb.mxu3 %vm1149_vm14, %v1607_v21 }
 0x412   :  { %1375 = vmatpush.msk.msrb.mxu3 %vm1148_vm15, %v1607_v21 }
 0x413   :  { %1049 = vmatmul.f32.gmra.mxu3 %v995_v33 }
 0x414   :  { %1376 = vmatpush.msk.msrb.mxu3 %vm1147_vm0, %v1607_v21 }
 0x416   :  { %1377 = vmatpush.msk.msrb.mxu3 %vm1146_vm1, %v1607_v21 }
 0x418   :  { %1378 = vmatpush.msk.msrb.mxu3 %vm1145_vm2, %v1607_v21 }
 0x41a   :  { %1379 = vmatpush.msk.msrb.mxu3 %vm1144_vm3, %v1607_v21 }
 0x41b   :  { %1052 = vmatmul.f32.gmra.mxu3 %v997_v41 }
 0x41c   :  { %1380 = vmatpush.msk.msrb.mxu3 %vm1143_vm4, %v1607_v21 }
 0x41e   :  { %1381 = vmatpush.msk.msrb.mxu3 %vm1142_vm5, %v1607_v21 }
 0x420   :  { %1382 = vmatpush.msk.msrb.mxu3 %vm1141_vm6, %v1607_v21 }
 0x422   :  { %1383 = vmatpush.msk.msrb.mxu3 %vm1140_vm7, %v1607_v21 }
 0x423   :  { %1236 = vmatmul.f32.vlgmr.msra.gmra.mxu3 %v2430_v46 }
 0x42b   :  { %1239 = vmatmul.f32.gmra.mxu3 %v2456_v6 }
 0x433   :  { %1242 = vmatmul.f32.gmra.mxu3 %v2495_v23 }
 0x43b   :  { %1245 = vmatmul.f32.gmra.mxu3 %v2526_v26 }
 0x443   :  { %1265 = vmatmul.f32.vlgmr.msrb.gmra.mxu3 %v2547_v61 }
 0x44b   :  { %1268 = vmatmul.f32.gmra.mxu3 %v993_v17 }
 0x453   :  { %1271 = vmatmul.f32.gmra.mxu3 %v995_v33 }
 0x45b   :  { %1274 = vmatmul.f32.gmra.mxu3 %v997_v41 }
 0x466   :  { %v1015_v11 = vpop.f32.mrf.mxu3 }
 0x46e   :  { %v1018_v51 = vpop.f32.mrf.mxu3 }
 0x476   :  { %v1021_v37 = vpop.f32.mrf.mxu3 }
 0x47e   :  { %v1024_v45 = vpop.f32.mrf.mxu3 }
 0x486   :  { %v1044_v5 = vpop.f32.mrf.mxu3 }
 0x487   :  { %v1045_v25 = vadd.f32 %v1044_v5, %v1015_v11 }
 0x489   :  { %1056 = vst [vmem:[#allocation7] sm:$0xff] %v1045_v25 }
 0x48e   :  { %v1047_v46 = vpop.f32.mrf.mxu3 }
 0x48f   :  { %v1048_v21 = vadd.f32 %v1047_v46, %v1018_v51 }
 0x491   :  { %1057 = vst [vmem:[#allocation7 + $0x8] sm:$0xff] %v1048_v21 }
 0x496   :  { %v1050_v6 = vpop.f32.mrf.mxu3 }
 0x497   :  { %v1051_v38 = vadd.f32 %v1050_v6, %v1021_v37 }
 0x499   :  { %1058 = vst [vmem:[#allocation7 + $0x10] sm:$0xff] %v1051_v38 }
 0x49e   :  { %v1053_v23 = vpop.f32.mrf.mxu3 }
 0x49f   :  { %v1054_v26 = vadd.f32 %v1053_v23, %v1024_v45 }
 0x4a1   :  { %1059 = vst [vmem:[#allocation7 + $0x18] sm:$0xff] %v1054_v26 }
 0x4a2   :  { %1294 = dma.vmem_to_hbm [thread:$0]  %s1287_s1, 512, %s1289_s26, [#allocation4], %s1604_s20, %s1604_s20, %s1605_s21  }
 0x4a6   :  { %v1237_v63 = vpop.f32.mrf.mxu3 }
 0x4ae   :  { %v1240_v61 = vpop.f32.mrf.mxu3 }
 0x4b6   :  { %v1243_v58 = vpop.f32.mrf.mxu3 }
 0x4be   :  { %v1246_v18 = vpop.f32.mrf.mxu3 }
 0x4c6   :  { %v1266_v36 = vpop.f32.mrf.mxu3 }
 0x4c7   :  { %v1267_v48 = vadd.f32 %v1266_v36, %v1237_v63 }
 0x4c9   :  { %1278 = vst [vmem:[#allocation8] sm:$0xff] %v1267_v48 }
 0x4ce   :  { %v1269_v2 = vpop.f32.mrf.mxu3 }
 0x4cf   :  { %v1270_v13 = vadd.f32 %v1269_v2, %v1240_v61 }
 0x4d1   :  { %1279 = vst [vmem:[#allocation8 + $0x8] sm:$0xff] %v1270_v13 }
 0x4d6   :  { %v1272_v3 = vpop.f32.mrf.mxu3 }
 0x4d7   :  { %v1273_v32 = vadd.f32 %v1272_v3, %v1243_v58 }
 0x4d9   :  { %1280 = vst [vmem:[#allocation8 + $0x10] sm:$0xff] %v1273_v32 }
 0x4de   :  { %v1275_v62 = vpop.f32.mrf.mxu3 }
 0x4df   :  { %v1276_v31 = vadd.f32 %v1275_v62, %v1246_v18 }
 0x4e1   :  { %1281 = vst [vmem:[#allocation8 + $0x18] sm:$0xff] %v1276_v31 }
 0x4e2   :  { %1307 = dma.vmem_to_hbm [thread:$0]  %s1300_s27, 512, %s1302_s30, [#allocation9], %s1604_s20, %s1604_s20, %s1605_s21  }
 0x4e3   :  { %1599 = dma.done.wait [#allocation4], 512  }
 0x4e4   :  { %1600 = vsyncadd [#allocation4], 4294966784 }
 0x4e5   :  { %1601 = dma.done.wait [#allocation9], 512  }
 0x4e6   :  { %1602 = vsyncadd [#allocation9], 4294966784 }
 0x4e7   :  { %1316 = vsyncpa [#allocation3], 1 }
 0x4e8   :  { %1317 = vsyncpa [#allocation6], 1 }
 0x4e9   :  { %1318 = vsyncpa [#allocation4], 1 }
 0x4ea   :  { %1319 = vsyncpa [#allocation9], 1 }

</bundles_post_ra>
